<compile_context>
chip_gen: v5e
topology: v5e:2x2
jax: 0.10.0
libtpu: 0.0.40
codegen_flags: <defaults>
</compile_context>

<pallas_src>
import functools

import jax
import jax.numpy as jnp
from jax.experimental import pallas as pl
from jax.experimental.pallas import tpu as pltpu


_VMEM = pl.BlockSpec(memory_space=pltpu.MemorySpace.VMEM)


def _fold_lane_blocks(v, blocks, width):
    """Sum `blocks` contiguous lane blocks of `width` lanes down to one block."""
    n = blocks
    while n > 1:
        half = n // 2
        v = v[:, : half * width] + v[:, half * width: n * width]
        n = half
    return v


def _tile_lanes(v, reps):
    return jnp.concatenate([v] * reps, axis=1)


# --------------------- Kernel 1: embeddings + KL + decoder1 ---------------------

def _embed_decoder1_kernel(input_c_ref, noise_ref, input_d_ref,
                           mu_ref, sigma_ref, noise_d_ref, lc_w_ref,
                           d1_wc_ref, d1_wz_ref, d1_wd_ref, d1_b_ref,
                           bn1_g_ref, bn1_b_ref,
                           h_ref, negkl_ref, *, eps):
    f32 = jnp.float32
    mu = mu_ref[...]
    sigma = sigma_ref[...]
    # numerically stable softplus(sigma) = log(1 + exp(sigma))
    sp = jnp.maximum(sigma, 0.0) + jnp.log(1.0 + jnp.exp(-jnp.abs(sigma)))

    # theta = mu + softplus(sigma) * noise_d ;  embed_d = input_d @ theta
    theta = mu + sp * noise_d_ref[...]
    embed_d = jnp.dot(input_d_ref[...], theta, preferred_element_type=f32)

    # embed_c = lc(input_c)   (bias-free Linear)
    embed_c = jnp.dot(input_c_ref[...], lc_w_ref[...], preferred_element_type=f32)

    # -KL_reg = -sum_j ( 1 + log(softplus(sigma)^2) - mu^2 - softplus(sigma)^2 )
    kl = 1.0 + 2.0 * jnp.log(sp) - mu * mu - sp * sp
    negkl_ref[...] = -jnp.sum(kl, axis=1, keepdims=True)

    # decoder1 Linear applied to cat(embed_c, noise, embed_d): three partial
    # matmuls into one accumulator instead of materialising the concat.
    h = (jnp.dot(embed_c, d1_wc_ref[...], preferred_element_type=f32)
         + jnp.dot(noise_ref[...], d1_wz_ref[...], preferred_element_type=f32)
         + jnp.dot(embed_d, d1_wd_ref[...], preferred_element_type=f32)
         + d1_b_ref[...])

    # BatchNorm1d (training mode: per-feature batch mean / biased var) + ReLU
    mean = jnp.mean(h, axis=0, keepdims=True)
    var = jnp.mean((h - mean) ** 2, axis=0, keepdims=True)
    hn = (h - mean) * jax.lax.rsqrt(var + eps) * bn1_g_ref[...] + bn1_b_ref[...]
    h_ref[...] = jnp.maximum(hn, 0.0)


def _embed_decoder1(kp, noise, input_c, input_d, noise_d, eps=1e-5):
    B = noise.shape[0]
    d1_out = kp["d1_b"].shape[1]
    do_num = kp["mu"].shape[0]
    return pl.pallas_call(
        functools.partial(_embed_decoder1_kernel, eps=eps),
        out_shape=(jax.ShapeDtypeStruct((B, d1_out), jnp.float32),
                   jax.ShapeDtypeStruct((do_num, 1), jnp.float32)),
        in_specs=[_VMEM] * 13,
        out_specs=(_VMEM, _VMEM),
    )(input_c, noise, input_d, kp["mu"], kp["sigma"], noise_d, kp["lc_w"],
      kp["d1_wc"], kp["d1_wz"], kp["d1_wd"], kp["d1_b"],
      kp["bn1_g"], kp["bn1_b"])


# ------------------- Kernel 2: the entire deconv / BN / tanh stack ------------------

def _decoder2_kernel(x1_ref, w1_ref, b1_ref, g2_ref, be2_ref,
                     w2_ref, b2_ref, g3_ref, be3_ref,
                     w3_ref, b3_ref, out_ref, *, eps, c2, c3):
    f32 = jnp.float32
    m = x1_ref.shape[0]                      # M = B*4*4 pixel rows

    # ---- ConvTranspose2d #1: all 4 (kh,kw) offsets fused along lanes.
    y1 = jnp.dot(x1_ref[...], w1_ref[...], preferred_element_type=f32) + b1_ref[...]

    # ---- BatchNorm2d #2 stats over (N,H,W) == rows x 4 offset lane-blocks.
    n2 = 4.0 * m
    mean2 = _fold_lane_blocks(jnp.sum(y1, axis=0, keepdims=True), 4, c2) / n2
    var2 = jnp.maximum(
        _fold_lane_blocks(jnp.sum(y1 * y1, axis=0, keepdims=True), 4, c2) / n2
        - mean2 * mean2, 0.0)                # biased var, clamped
    scale2 = jax.lax.rsqrt(var2 + eps) * g2_ref[...]
    shift2 = be2_ref[...] - mean2 * scale2
    x2 = jnp.maximum(y1 * _tile_lanes(scale2, 4) + _tile_lanes(shift2, 4), 0.0)

    # ---- ConvTranspose2d #2: block-diagonal weight over the 4 offset blocks.
    y2 = jnp.dot(x2, w2_ref[...], preferred_element_type=f32) + b2_ref[...]

    # ---- BatchNorm2d #3 stats over rows x 16 offset lane-blocks.
    n3 = 16.0 * m
    mean3 = _fold_lane_blocks(jnp.sum(y2, axis=0, keepdims=True), 16, c3) / n3
    var3 = jnp.maximum(
        _fold_lane_blocks(jnp.sum(y2 * y2, axis=0, keepdims=True), 16, c3) / n3
        - mean3 * mean3, 0.0)
    scale3 = jax.lax.rsqrt(var3 + eps) * g3_ref[...]
    shift3 = be3_ref[...] - mean3 * scale3
    x3 = jnp.maximum(y2 * _tile_lanes(scale3, 16) + _tile_lanes(shift3, 16), 0.0)

    # ---- ConvTranspose2d #3: block-diagonal over all 16 blocks, + Tanh.
    y3 = jnp.dot(x3, w3_ref[...], preferred_element_type=f32) + b3_ref[...]
    out_ref[...] = jnp.tanh(y3)              # single lane-dense store [M, 64*i_dim]


def _decoder2(kp, x1, i_dim, eps=1e-5):
    M = x1.shape[0]
    c2 = kp["bn2_g"].shape[1]
    c3 = kp["bn3_g"].shape[1]
    return pl.pallas_call(
        functools.partial(_decoder2_kernel, eps=eps, c2=c2, c3=c3),
        out_shape=jax.ShapeDtypeStruct((M, 64 * i_dim), jnp.float32),
        in_specs=[_VMEM] * 11,
        out_specs=_VMEM,
    )(x1, kp["c1_w"], kp["c1_b"], kp["bn2_g"], kp["bn2_b"],
      kp["c2_w"], kp["c2_b"], kp["bn3_g"], kp["bn3_b"],
      kp["c3_w"], kp["c3_b"])


# ------------------------------ parameters & glue ------------------------------

def init_params(key, i_dim, cl_num, do_num, cl_dim, do_dim, z_dim, ch):
    """Parameters in the same layout as the PyTorch module."""
    ks = jax.random.split(key, 8)
    f32 = jnp.float32
    d1_out = ch * 4 * 4 * 4
    d1_in = z_dim + cl_dim + do_dim
    return {
        "mu": jnp.zeros((do_num, do_dim), f32),
        "sigma": jnp.zeros((do_num, do_dim), f32),
        "lc_w": 0.1 * jax.random.normal(ks[0], (cl_dim, cl_num), f32),   # Linear.weight [out, in]
        "d1_w": 0.1 * jax.random.normal(ks[1], (d1_out, d1_in), f32),    # Linear.weight [out, in]
        "d1_b": 0.01 * jax.random.normal(ks[2], (d1_out,), f32),
        "bn1_g": jnp.ones((d1_out,), f32), "bn1_b": jnp.zeros((d1_out,), f32),
        "c1_w": 0.1 * jax.random.normal(ks[3], (ch * 4, ch * 2, 2, 2), f32),  # ConvT [in, out, kh, kw]
        "c1_b": jnp.zeros((ch * 2,), f32),
        "bn2_g": jnp.ones((ch * 2,), f32), "bn2_b": jnp.zeros((ch * 2,), f32),
        "c2_w": 0.1 * jax.random.normal(ks[4], (ch * 2, ch, 2, 2), f32),
        "c2_b": jnp.zeros((ch,), f32),
        "bn3_g": jnp.ones((ch,), f32), "bn3_b": jnp.zeros((ch,), f32),
        "c3_w": 0.1 * jax.random.normal(ks[5], (ch, i_dim, 2, 2), f32),
        "c3_b": jnp.zeros((i_dim,), f32),
    }


def prepare_params(p, *, ch, cl_dim, z_dim, do_dim, i_dim):
    """One-time repack of PyTorch-layout parameters into kernel-friendly layout."""
    c1, c2, c3 = ch * 4, ch * 2, ch
    f32 = jnp.float32

    # decoder1 Linear as [in, out]; output features reordered from PyTorch's
    # (channel, i, j) to pixel-major (i, j, channel) so the [B,512]->[B*16,C1]
    # reshape after the kernel is a free bitcast (no transpose).
    w = p["d1_w"].T.reshape(-1, c1, 4, 4).transpose(0, 2, 3, 1).reshape(-1, c1 * 16)

    def pix_major(v):
        return v.reshape(c1, 4, 4).transpose(1, 2, 0).reshape(1, c1 * 16)

    def conv_fuse(w4):  # [Cin, Cout, 2, 2] -> [Cin, 4*Cout], cols ordered (kh, kw, cout)
        return jnp.transpose(w4, (0, 2, 3, 1)).reshape(w4.shape[0], 4 * w4.shape[1])

    w1f = conv_fuse(p["c1_w"])                       # [C1, 4*C2]
    w2f = conv_fuse(p["c2_w"])                       # [C2, 4*C3]
    w3f = conv_fuse(p["c3_w"])                       # [C3, 4*i_dim]
    eye4 = jnp.eye(4, dtype=f32)
    eye16 = jnp.eye(16, dtype=f32)

    return {
        "mu": p["mu"], "sigma": p["sigma"],
        "lc_w": p["lc_w"].T,                                   # [cl_num, cl_dim]
        "d1_wc": w[:cl_dim],                                   # rows for embed_c
        "d1_wz": w[cl_dim:cl_dim + z_dim],                     # rows for noise
        "d1_wd": w[cl_dim + z_dim:],                           # rows for embed_d
        "d1_b": pix_major(p["d1_b"]),
        "bn1_g": pix_major(p["bn1_g"]), "bn1_b": pix_major(p["bn1_b"]),
        # deconv #1: 4 offsets fused along lanes, cols (kh1, kw1, c2)
        "c1_w": w1f,
        "c1_b": jnp.tile(p["c1_b"], 4).reshape(1, 4 * c2),
        "bn2_g": p["bn2_g"].reshape(1, c2), "bn2_b": p["bn2_b"].reshape(1, c2),
        # deconv #2: block-diagonal over the 4 input offset blocks,
        # cols (kh1, kw1, kh2, kw2, c3)
        "c2_w": jnp.kron(eye4, w2f),                           # [4*C2, 16*C3]
        "c2_b": jnp.tile(p["c2_b"], 16).reshape(1, 16 * c3),
        "bn3_g": p["bn3_g"].reshape(1, c3), "bn3_b": p["bn3_b"].reshape(1, c3),
        # deconv #3: block-diagonal over all 16 blocks,
        # cols (kh1, kw1, kh2, kw2, kh3, kw3, co)
        "c3_w": jnp.kron(eye16, w3f),                          # [16*C3, 64*i_dim]
        "c3_b": jnp.tile(p["c3_b"], 64).reshape(1, 64 * i_dim),
    }


def cnn_generator_exp_forward(kp, noise, input_c, input_d, noise_d, *, ch, i_dim):
    B = noise.shape[0]
    h, negkl = _embed_decoder1(kp, noise, input_c, input_d, noise_d)

    # pixel-major feature order -> free row-major reshape: rows = (b, i1, j1)
    x1 = h.reshape(B * 16, ch * 4)

    y = _decoder2(kp, x1, i_dim)            # [B*16, 64*i_dim]

    # Undo the offset-major pixel scrambling with a single tiny XLA transpose.
    # rows = (b, i1, j1); cols = (kh1, kw1, kh2, kw2, kh3, kw3, co)
    # H = 8*i1 + 4*kh1 + 2*kh2 + kh3 ; W = 8*j1 + 4*kw1 + 2*kw2 + kw3
    y = y.reshape(B, 4, 4, 2, 2, 2, 2, 2, 2, i_dim)
    y = jnp.transpose(y, (0, 9, 1, 3, 5, 7, 2, 4, 6, 8))
    out = y.reshape(B, i_dim, 32, 32)       # NCHW, as in the PyTorch module
    return out, negkl[:, 0]


# -------------------------- plain-JAX reference (for checking) --------------------------

def _reference_forward(p, noise, input_c, input_d, noise_d, *, ch, i_dim, eps=1e-5):
    sp = jax.nn.softplus(p["sigma"])
    theta = p["mu"] + sp * noise_d
    embed_d = input_d @ theta
    embed_c = input_c @ p["lc_w"].T
    x = jnp.concatenate((embed_c, noise, embed_d), axis=1)
    h = x @ p["d1_w"].T + p["d1_b"]
    mean, var = h.mean(0), h.var(0)
    h = jnp.maximum((h - mean) / jnp.sqrt(var + eps) * p["bn1_g"] + p["bn1_b"], 0.0)
    B = noise.shape[0]
    out = h.reshape(B, ch * 4, 4, 4)

    def deconv(x_nchw, w, b):
        y = jnp.einsum("bcij,cokl->boikjl", x_nchw, w)
        Bb, Co, H, _, W, _ = y.shape
        return y.reshape(Bb, Co, 2 * H, 2 * W) + b[None, :, None, None]

    def bn2d(x, g, be):
        m = x.mean(axis=(0, 2, 3), keepdims=True)
        v = x.var(axis=(0, 2, 3), keepdims=True)
        return (x - m) / jnp.sqrt(v + eps) * g[None, :, None, None] + be[None, :, None, None]

    out = jnp.maximum(bn2d(deconv(out, p["c1_w"], p["c1_b"]), p["bn2_g"], p["bn2_b"]), 0.0)
    out = jnp.maximum(bn2d(deconv(out, p["c2_w"], p["c2_b"]), p["bn3_g"], p["bn3_b"]), 0.0)
    out = jnp.tanh(deconv(out, p["c3_w"], p["c3_b"]))
    kl = 1.0 + jnp.log(sp ** 2) - p["mu"] ** 2 - sp ** 2
    return out, -kl.sum(axis=1)


# --------------------------------------- main ---------------------------------------

if __name__ == "__main__":
    i_dim, cl_num, do_num, cl_dim, do_dim, z_dim, ch = 3, 4, 5, 8, 8, 16, 8
    B = 2

    key = jax.random.PRNGKey(0)
    k_par, k_n, k_c, k_d, k_nd = jax.random.split(key, 5)

    torch_params = init_params(k_par, i_dim, cl_num, do_num, cl_dim, do_dim, z_dim, ch)
    kparams = prepare_params(torch_params, ch=ch, cl_dim=cl_dim, z_dim=z_dim,
                             do_dim=do_dim, i_dim=i_dim)

    noise = jax.random.normal(k_n, (B, z_dim), jnp.float32)
    input_c = jax.random.normal(k_c, (B, cl_num), jnp.float32)
    input_d = jax.random.normal(k_d, (B, do_num), jnp.float32)
    noise_d = jax.random.normal(k_nd, (do_num, do_dim), jnp.float32)

    fwd = jax.jit(functools.partial(cnn_generator_exp_forward, ch=ch, i_dim=i_dim))
    out, neg_kl = fwd(kparams, noise, input_c, input_d, noise_d)
    jax.block_until_ready((out, neg_kl))

    assert out.shape == (B, i_dim, 32, 32), out.shape
    assert neg_kl.shape == (do_num,), neg_kl.shape
    assert bool(jnp.all(jnp.isfinite(out))) and bool(jnp.all(jnp.isfinite(neg_kl)))

    # cross-check against a plain-JAX reference of the PyTorch forward
    ref_out, ref_kl = _reference_forward(torch_params, noise, input_c, input_d,
                                         noise_d, ch=ch, i_dim=i_dim)
    assert bool(jnp.allclose(out, ref_out, atol=1e-3, rtol=1e-3)), \
        float(jnp.max(jnp.abs(out - ref_out)))
    assert bool(jnp.allclose(neg_kl, ref_kl, atol=1e-3, rtol=1e-3)), \
        float(jnp.max(jnp.abs(neg_kl - ref_kl)))

    print("KERNEL_OK")
</pallas_src>

<mosaic_0001>
module attributes {stable_mosaic.version = 11 : i64} {
  func.func @_embed_decoder1_kernel(%arg0: memref<2x4xf32, #tpu.memory_space<vmem>>, %arg1: memref<2x16xf32, #tpu.memory_space<vmem>>, %arg2: memref<2x5xf32, #tpu.memory_space<vmem>>, %arg3: memref<5x8xf32, #tpu.memory_space<vmem>>, %arg4: memref<5x8xf32, #tpu.memory_space<vmem>>, %arg5: memref<5x8xf32, #tpu.memory_space<vmem>>, %arg6: memref<4x8xf32, #tpu.memory_space<vmem>>, %arg7: memref<8x512xf32, #tpu.memory_space<vmem>>, %arg8: memref<16x512xf32, #tpu.memory_space<vmem>>, %arg9: memref<8x512xf32, #tpu.memory_space<vmem>>, %arg10: memref<1x512xf32, #tpu.memory_space<vmem>>, %arg11: memref<1x512xf32, #tpu.memory_space<vmem>>, %arg12: memref<1x512xf32, #tpu.memory_space<vmem>>, %arg13: memref<2x512xf32, #tpu.memory_space<vmem>>, %arg14: memref<5x1xf32, #tpu.memory_space<vmem>>) attributes {dimension_semantics = [], scalar_prefetch = 0 : i64, scratch_operands = 0 : i64, tpu.core_type = #tpu.core_type<tc>} {
    %c0 = arith.constant 0 : index
    %c0_0 = arith.constant 0 : index
    %0 = vector.load %arg3[%c0, %c0_0] : memref<5x8xf32, #tpu.memory_space<vmem>>, vector<5x8xf32>
    %c0_1 = arith.constant 0 : index
    %c0_2 = arith.constant 0 : index
    %1 = vector.load %arg4[%c0_1, %c0_2] : memref<5x8xf32, #tpu.memory_space<vmem>>, vector<5x8xf32>
    %cst = arith.constant 0.000000e+00 : f32
    %2 = vector.broadcast %cst : f32 to vector<5x8xf32>
    %3 = arith.maximumf %1, %2 : vector<5x8xf32>
    %4 = math.absf %1 : vector<5x8xf32>
    %cst_3 = arith.constant 0.000000e+00 : f32
    %5 = vector.broadcast %cst_3 : f32 to vector<5x8xf32>
    %6 = arith.subf %5, %4 : vector<5x8xf32>
    %7 = math.exp %6 : vector<5x8xf32>
    %cst_4 = arith.constant 1.000000e+00 : f32
    %8 = vector.broadcast %cst_4 : f32 to vector<5x8xf32>
    %9 = arith.addf %8, %7 : vector<5x8xf32>
    %10 = math.log %9 : vector<5x8xf32>
    %11 = arith.addf %3, %10 : vector<5x8xf32>
    %c0_5 = arith.constant 0 : index
    %c0_6 = arith.constant 0 : index
    %12 = vector.load %arg5[%c0_5, %c0_6] : memref<5x8xf32, #tpu.memory_space<vmem>>, vector<5x8xf32>
    %13 = arith.mulf %11, %12 : vector<5x8xf32>
    %14 = arith.addf %0, %13 : vector<5x8xf32>
    %c0_7 = arith.constant 0 : index
    %c0_8 = arith.constant 0 : index
    %15 = vector.load %arg2[%c0_7, %c0_8] : memref<2x5xf32, #tpu.memory_space<vmem>>, vector<2x5xf32>
    %cst_9 = arith.constant dense<0.000000e+00> : vector<2x8xf32>
    %16 = tpu.matmul %15, %14, %cst_9 {dimension_numbers = #tpu.dot_dimension_numbers<[1], [0], [0], [1], [0, 0, 1, 1], [], []>} : vector<2x5xf32>, vector<5x8xf32>, vector<2x8xf32> -> vector<2x8xf32>
    %c0_10 = arith.constant 0 : index
    %c0_11 = arith.constant 0 : index
    %17 = vector.load %arg0[%c0_10, %c0_11] : memref<2x4xf32, #tpu.memory_space<vmem>>, vector<2x4xf32>
    %c0_12 = arith.constant 0 : index
    %c0_13 = arith.constant 0 : index
    %18 = vector.load %arg6[%c0_12, %c0_13] : memref<4x8xf32, #tpu.memory_space<vmem>>, vector<4x8xf32>
    %cst_14 = arith.constant dense<0.000000e+00> : vector<2x8xf32>
    %19 = tpu.matmul %17, %18, %cst_14 {dimension_numbers = #tpu.dot_dimension_numbers<[1], [0], [0], [1], [0, 0, 1, 1], [], []>} : vector<2x4xf32>, vector<4x8xf32>, vector<2x8xf32> -> vector<2x8xf32>
    %20 = math.log %11 : vector<5x8xf32>
    %cst_15 = arith.constant 2.000000e+00 : f32
    %21 = vector.broadcast %cst_15 : f32 to vector<5x8xf32>
    %22 = arith.mulf %21, %20 : vector<5x8xf32>
    %cst_16 = arith.constant 1.000000e+00 : f32
    %23 = vector.broadcast %cst_16 : f32 to vector<5x8xf32>
    %24 = arith.addf %23, %22 : vector<5x8xf32>
    %25 = arith.mulf %0, %0 : vector<5x8xf32>
    %26 = arith.subf %24, %25 : vector<5x8xf32>
    %27 = arith.mulf %11, %11 : vector<5x8xf32>
    %28 = arith.subf %26, %27 : vector<5x8xf32>
    %cst_17 = arith.constant dense<0.000000e+00> : vector<5xf32>
    %29 = vector.multi_reduction <add>, %28, %cst_17 [1] : vector<5x8xf32> to vector<5xf32>
    %30 = vector.shape_cast %29 : vector<5xf32> to vector<5x1xf32>
    %cst_18 = arith.constant 0.000000e+00 : f32
    %31 = vector.broadcast %cst_18 : f32 to vector<5x1xf32>
    %32 = arith.subf %31, %30 : vector<5x1xf32>
    %c0_19 = arith.constant 0 : index
    %c0_20 = arith.constant 0 : index
    %33 = vector.load %arg14[%c0_19, %c0_20] : memref<5x1xf32, #tpu.memory_space<vmem>>, vector<5x1xf32>
    tpu.vector_store %arg14[%c0_19, %c0_20], %32 {strides = array<i32>} : memref<5x1xf32, #tpu.memory_space<vmem>>, vector<5x1xf32>,
    %c0_21 = arith.constant 0 : index
    %c0_22 = arith.constant 0 : index
    %34 = vector.load %arg7[%c0_21, %c0_22] : memref<8x512xf32, #tpu.memory_space<vmem>>, vector<8x512xf32>
    %cst_23 = arith.constant dense<0.000000e+00> : vector<2x512xf32>
    %35 = tpu.matmul %19, %34, %cst_23 {dimension_numbers = #tpu.dot_dimension_numbers<[1], [0], [0], [1], [0, 0, 1, 1], [], []>} : vector<2x8xf32>, vector<8x512xf32>, vector<2x512xf32> -> vector<2x512xf32>
    %c0_24 = arith.constant 0 : index
    %c0_25 = arith.constant 0 : index
    %36 = vector.load %arg1[%c0_24, %c0_25] : memref<2x16xf32, #tpu.memory_space<vmem>>, vector<2x16xf32>
    %c0_26 = arith.constant 0 : index
    %c0_27 = arith.constant 0 : index
    %37 = vector.load %arg8[%c0_26, %c0_27] : memref<16x512xf32, #tpu.memory_space<vmem>>, vector<16x512xf32>
    %cst_28 = arith.constant dense<0.000000e+00> : vector<2x512xf32>
    %38 = tpu.matmul %36, %37, %cst_28 {dimension_numbers = #tpu.dot_dimension_numbers<[1], [0], [0], [1], [0, 0, 1, 1], [], []>} : vector<2x16xf32>, vector<16x512xf32>, vector<2x512xf32> -> vector<2x512xf32>
    %39 = arith.addf %35, %38 : vector<2x512xf32>
    %c0_29 = arith.constant 0 : index
    %c0_30 = arith.constant 0 : index
    %40 = vector.load %arg9[%c0_29, %c0_30] : memref<8x512xf32, #tpu.memory_space<vmem>>, vector<8x512xf32>
    %cst_31 = arith.constant dense<0.000000e+00> : vector<2x512xf32>
    %41 = tpu.matmul %16, %40, %cst_31 {dimension_numbers = #tpu.dot_dimension_numbers<[1], [0], [0], [1], [0, 0, 1, 1], [], []>} : vector<2x8xf32>, vector<8x512xf32>, vector<2x512xf32> -> vector<2x512xf32>
    %42 = arith.addf %39, %41 : vector<2x512xf32>
    %c0_32 = arith.constant 0 : index
    %c0_33 = arith.constant 0 : index
    %43 = vector.load %arg10[%c0_32, %c0_33] : memref<1x512xf32, #tpu.memory_space<vmem>>, vector<1x512xf32>
    %44 = vector.broadcast %43 : vector<1x512xf32> to vector<2x512xf32>
    %45 = arith.addf %42, %44 : vector<2x512xf32>
    %cst_34 = arith.constant dense<0.000000e+00> : vector<512xf32>
    %46 = vector.multi_reduction <add>, %45, %cst_34 [0] : vector<2x512xf32> to vector<512xf32>
    %47 = vector.shape_cast %46 : vector<512xf32> to vector<1x512xf32>
    %cst_35 = arith.constant 2.000000e+00 : f32
    %48 = vector.broadcast %cst_35 : f32 to vector<1x512xf32>
    %49 = arith.divf %47, %48 : vector<1x512xf32>
    %50 = vector.broadcast %49 : vector<1x512xf32> to vector<2x512xf32>
    %51 = arith.subf %45, %50 : vector<2x512xf32>
    %52 = arith.mulf %51, %51 : vector<2x512xf32>
    %cst_36 = arith.constant dense<0.000000e+00> : vector<512xf32>
    %53 = vector.multi_reduction <add>, %52, %cst_36 [0] : vector<2x512xf32> to vector<512xf32>
    %54 = vector.shape_cast %53 : vector<512xf32> to vector<1x512xf32>
    %cst_37 = arith.constant 2.000000e+00 : f32
    %55 = vector.broadcast %cst_37 : f32 to vector<1x512xf32>
    %56 = arith.divf %54, %55 : vector<1x512xf32>
    %57 = vector.broadcast %49 : vector<1x512xf32> to vector<2x512xf32>
    %58 = arith.subf %45, %57 : vector<2x512xf32>
    %cst_38 = arith.constant 9.99999974E-6 : f32
    %59 = vector.broadcast %cst_38 : f32 to vector<1x512xf32>
    %60 = arith.addf %56, %59 : vector<1x512xf32>
    %61 = math.rsqrt %60 : vector<1x512xf32>
    %62 = vector.broadcast %61 : vector<1x512xf32> to vector<2x512xf32>
    %63 = arith.mulf %58, %62 : vector<2x512xf32>
    %c0_39 = arith.constant 0 : index
    %c0_40 = arith.constant 0 : index
    %64 = vector.load %arg11[%c0_39, %c0_40] : memref<1x512xf32, #tpu.memory_space<vmem>>, vector<1x512xf32>
    %65 = vector.broadcast %64 : vector<1x512xf32> to vector<2x512xf32>
    %66 = arith.mulf %63, %65 : vector<2x512xf32>
    %c0_41 = arith.constant 0 : index
    %c0_42 = arith.constant 0 : index
    %67 = vector.load %arg12[%c0_41, %c0_42] : memref<1x512xf32, #tpu.memory_space<vmem>>, vector<1x512xf32>
    %68 = vector.broadcast %67 : vector<1x512xf32> to vector<2x512xf32>
    %69 = arith.addf %66, %68 : vector<2x512xf32>
    %cst_43 = arith.constant 0.000000e+00 : f32
    %70 = vector.broadcast %cst_43 : f32 to vector<2x512xf32>
    %71 = arith.maximumf %69, %70 : vector<2x512xf32>
    %c0_44 = arith.constant 0 : index
    %c0_45 = arith.constant 0 : index
    %72 = vector.load %arg13[%c0_44, %c0_45] : memref<2x512xf32, #tpu.memory_space<vmem>>, vector<2x512xf32>
    tpu.vector_store %arg13[%c0_44, %c0_45], %71 {strides = array<i32>} : memref<2x512xf32, #tpu.memory_space<vmem>>, vector<2x512xf32>,
    return
  }
}

module attributes {stable_mosaic.version = 11 : i64} {
  func.func @_decoder2_kernel(%arg0: memref<32x32xf32, #tpu.memory_space<vmem>>, %arg1: memref<32x64xf32, #tpu.memory_space<vmem>>, %arg2: memref<1x64xf32, #tpu.memory_space<vmem>>, %arg3: memref<1x16xf32, #tpu.memory_space<vmem>>, %arg4: memref<1x16xf32, #tpu.memory_space<vmem>>, %arg5: memref<64x128xf32, #tpu.memory_space<vmem>>, %arg6: memref<1x128xf32, #tpu.memory_space<vmem>>, %arg7: memref<1x8xf32, #tpu.memory_space<vmem>>, %arg8: memref<1x8xf32, #tpu.memory_space<vmem>>, %arg9: memref<128x192xf32, #tpu.memory_space<vmem>>, %arg10: memref<1x192xf32, #tpu.memory_space<vmem>>, %arg11: memref<32x192xf32, #tpu.memory_space<vmem>>) attributes {dimension_semantics = [], scalar_prefetch = 0 : i64, scratch_operands = 0 : i64, tpu.core_type = #tpu.core_type<tc>} {
    %c0 = arith.constant 0 : index
    %c0_0 = arith.constant 0 : index
    %0 = vector.load %arg0[%c0, %c0_0] : memref<32x32xf32, #tpu.memory_space<vmem>>, vector<32x32xf32>
    %c0_1 = arith.constant 0 : index
    %c0_2 = arith.constant 0 : index
    %1 = vector.load %arg1[%c0_1, %c0_2] : memref<32x64xf32, #tpu.memory_space<vmem>>, vector<32x64xf32>
    %cst = arith.constant dense<0.000000e+00> : vector<32x64xf32>
    %2 = tpu.matmul %0, %1, %cst {dimension_numbers = #tpu.dot_dimension_numbers<[1], [0], [0], [1], [0, 0, 1, 1], [], []>} : vector<32x32xf32>, vector<32x64xf32>, vector<32x64xf32> -> vector<32x64xf32>
    %c0_3 = arith.constant 0 : index
    %c0_4 = arith.constant 0 : index
    %3 = vector.load %arg2[%c0_3, %c0_4] : memref<1x64xf32, #tpu.memory_space<vmem>>, vector<1x64xf32>
    %4 = vector.broadcast %3 : vector<1x64xf32> to vector<32x64xf32>
    %5 = arith.addf %2, %4 : vector<32x64xf32>
    %cst_5 = arith.constant dense<0.000000e+00> : vector<64xf32>
    %6 = vector.multi_reduction <add>, %5, %cst_5 [0] : vector<32x64xf32> to vector<64xf32>
    %7 = vector.shape_cast %6 : vector<64xf32> to vector<1x64xf32>
    %8 = vector.extract_strided_slice %7 {offsets = [0, 0], sizes = [1, 32], strides = [1, 1]} : vector<1x64xf32> to vector<1x32xf32>
    %9 = vector.extract_strided_slice %7 {offsets = [0, 32], sizes = [1, 32], strides = [1, 1]} : vector<1x64xf32> to vector<1x32xf32>
    %10 = arith.addf %8, %9 : vector<1x32xf32>
    %11 = vector.extract_strided_slice %10 {offsets = [0, 0], sizes = [1, 16], strides = [1, 1]} : vector<1x32xf32> to vector<1x16xf32>
    %12 = vector.extract_strided_slice %10 {offsets = [0, 16], sizes = [1, 16], strides = [1, 1]} : vector<1x32xf32> to vector<1x16xf32>
    %13 = arith.addf %11, %12 : vector<1x16xf32>
    %cst_6 = arith.constant 1.280000e+02 : f32
    %14 = vector.broadcast %cst_6 : f32 to vector<1x16xf32>
    %15 = arith.divf %13, %14 : vector<1x16xf32>
    %16 = arith.mulf %5, %5 : vector<32x64xf32>
    %cst_7 = arith.constant dense<0.000000e+00> : vector<64xf32>
    %17 = vector.multi_reduction <add>, %16, %cst_7 [0] : vector<32x64xf32> to vector<64xf32>
    %18 = vector.shape_cast %17 : vector<64xf32> to vector<1x64xf32>
    %19 = vector.extract_strided_slice %18 {offsets = [0, 0], sizes = [1, 32], strides = [1, 1]} : vector<1x64xf32> to vector<1x32xf32>
    %20 = vector.extract_strided_slice %18 {offsets = [0, 32], sizes = [1, 32], strides = [1, 1]} : vector<1x64xf32> to vector<1x32xf32>
    %21 = arith.addf %19, %20 : vector<1x32xf32>
    %22 = vector.extract_strided_slice %21 {offsets = [0, 0], sizes = [1, 16], strides = [1, 1]} : vector<1x32xf32> to vector<1x16xf32>
    %23 = vector.extract_strided_slice %21 {offsets = [0, 16], sizes = [1, 16], strides = [1, 1]} : vector<1x32xf32> to vector<1x16xf32>
    %24 = arith.addf %22, %23 : vector<1x16xf32>
    %cst_8 = arith.constant 1.280000e+02 : f32
    %25 = vector.broadcast %cst_8 : f32 to vector<1x16xf32>
    %26 = arith.divf %24, %25 : vector<1x16xf32>
    %27 = arith.mulf %15, %15 : vector<1x16xf32>
    %28 = arith.subf %26, %27 : vector<1x16xf32>
    %cst_9 = arith.constant 0.000000e+00 : f32
    %29 = vector.broadcast %cst_9 : f32 to vector<1x16xf32>
    %30 = arith.maximumf %28, %29 : vector<1x16xf32>
    %cst_10 = arith.constant 9.99999974E-6 : f32
    %31 = vector.broadcast %cst_10 : f32 to vector<1x16xf32>
    %32 = arith.addf %30, %31 : vector<1x16xf32>
    %33 = math.rsqrt %32 : vector<1x16xf32>
    %c0_11 = arith.constant 0 : index
    %c0_12 = arith.constant 0 : index
    %34 = vector.load %arg3[%c0_11, %c0_12] : memref<1x16xf32, #tpu.memory_space<vmem>>, vector<1x16xf32>
    %35 = arith.mulf %33, %34 : vector<1x16xf32>
    %c0_13 = arith.constant 0 : index
    %c0_14 = arith.constant 0 : index
    %36 = vector.load %arg4[%c0_13, %c0_14] : memref<1x16xf32, #tpu.memory_space<vmem>>, vector<1x16xf32>
    %37 = arith.mulf %15, %35 : vector<1x16xf32>
    %38 = arith.subf %36, %37 : vector<1x16xf32>
    %39 = tpu.concatenate %35, %35, %35, %35 in 1 : vector<1x16xf32>, vector<1x16xf32>, vector<1x16xf32>, vector<1x16xf32> -> vector<1x64xf32>
    %40 = vector.broadcast %39 : vector<1x64xf32> to vector<32x64xf32>
    %41 = arith.mulf %5, %40 : vector<32x64xf32>
    %42 = tpu.concatenate %38, %38, %38, %38 in 1 : vector<1x16xf32>, vector<1x16xf32>, vector<1x16xf32>, vector<1x16xf32> -> vector<1x64xf32>
    %43 = vector.broadcast %42 : vector<1x64xf32> to vector<32x64xf32>
    %44 = arith.addf %41, %43 : vector<32x64xf32>
    %cst_15 = arith.constant 0.000000e+00 : f32
    %45 = vector.broadcast %cst_15 : f32 to vector<32x64xf32>
    %46 = arith.maximumf %44, %45 : vector<32x64xf32>
    %c0_16 = arith.constant 0 : index
    %c0_17 = arith.constant 0 : index
    %47 = vector.load %arg5[%c0_16, %c0_17] : memref<64x128xf32, #tpu.memory_space<vmem>>, vector<64x128xf32>
    %cst_18 = arith.constant dense<0.000000e+00> : vector<32x128xf32>
    %48 = tpu.matmul %46, %47, %cst_18 {dimension_numbers = #tpu.dot_dimension_numbers<[1], [0], [0], [1], [0, 0, 1, 1], [], []>} : vector<32x64xf32>, vector<64x128xf32>, vector<32x128xf32> -> vector<32x128xf32>
    %c0_19 = arith.constant 0 : index
    %c0_20 = arith.constant 0 : index
    %49 = vector.load %arg6[%c0_19, %c0_20] : memref<1x128xf32, #tpu.memory_space<vmem>>, vector<1x128xf32>
    %50 = vector.broadcast %49 : vector<1x128xf32> to vector<32x128xf32>
    %51 = arith.addf %48, %50 : vector<32x128xf32>
    %cst_21 = arith.constant dense<0.000000e+00> : vector<128xf32>
    %52 = vector.multi_reduction <add>, %51, %cst_21 [0] : vector<32x128xf32> to vector<128xf32>
    %53 = vector.shape_cast %52 : vector<128xf32> to vector<1x128xf32>
    %54 = vector.extract_strided_slice %53 {offsets = [0, 0], sizes = [1, 64], strides = [1, 1]} : vector<1x128xf32> to vector<1x64xf32>
    %55 = vector.extract_strided_slice %53 {offsets = [0, 64], sizes = [1, 64], strides = [1, 1]} : vector<1x128xf32> to vector<1x64xf32>
    %56 = arith.addf %54, %55 : vector<1x64xf32>
    %57 = vector.extract_strided_slice %56 {offsets = [0, 0], sizes = [1, 32], strides = [1, 1]} : vector<1x64xf32> to vector<1x32xf32>
    %58 = vector.extract_strided_slice %56 {offsets = [0, 32], sizes = [1, 32], strides = [1, 1]} : vector<1x64xf32> to vector<1x32xf32>
    %59 = arith.addf %57, %58 : vector<1x32xf32>
    %60 = vector.extract_strided_slice %59 {offsets = [0, 0], sizes = [1, 16], strides = [1, 1]} : vector<1x32xf32> to vector<1x16xf32>
    %61 = vector.extract_strided_slice %59 {offsets = [0, 16], sizes = [1, 16], strides = [1, 1]} : vector<1x32xf32> to vector<1x16xf32>
    %62 = arith.addf %60, %61 : vector<1x16xf32>
    %63 = vector.extract_strided_slice %62 {offsets = [0, 0], sizes = [1, 8], strides = [1, 1]} : vector<1x16xf32> to vector<1x8xf32>
    %64 = vector.extract_strided_slice %62 {offsets = [0, 8], sizes = [1, 8], strides = [1, 1]} : vector<1x16xf32> to vector<1x8xf32>
    %65 = arith.addf %63, %64 : vector<1x8xf32>
    %cst_22 = arith.constant 5.120000e+02 : f32
    %66 = vector.broadcast %cst_22 : f32 to vector<1x8xf32>
    %67 = arith.divf %65, %66 : vector<1x8xf32>
    %68 = arith.mulf %51, %51 : vector<32x128xf32>
    %cst_23 = arith.constant dense<0.000000e+00> : vector<128xf32>
    %69 = vector.multi_reduction <add>, %68, %cst_23 [0] : vector<32x128xf32> to vector<128xf32>
    %70 = vector.shape_cast %69 : vector<128xf32> to vector<1x128xf32>
    %71 = vector.extract_strided_slice %70 {offsets = [0, 0], sizes = [1, 64], strides = [1, 1]} : vector<1x128xf32> to vector<1x64xf32>
    %72 = vector.extract_strided_slice %70 {offsets = [0, 64], sizes = [1, 64], strides = [1, 1]} : vector<1x128xf32> to vector<1x64xf32>
    %73 = arith.addf %71, %72 : vector<1x64xf32>
    %74 = vector.extract_strided_slice %73 {offsets = [0, 0], sizes = [1, 32], strides = [1, 1]} : vector<1x64xf32> to vector<1x32xf32>
    %75 = vector.extract_strided_slice %73 {offsets = [0, 32], sizes = [1, 32], strides = [1, 1]} : vector<1x64xf32> to vector<1x32xf32>
    %76 = arith.addf %74, %75 : vector<1x32xf32>
    %77 = vector.extract_strided_slice %76 {offsets = [0, 0], sizes = [1, 16], strides = [1, 1]} : vector<1x32xf32> to vector<1x16xf32>
    %78 = vector.extract_strided_slice %76 {offsets = [0, 16], sizes = [1, 16], strides = [1, 1]} : vector<1x32xf32> to vector<1x16xf32>
    %79 = arith.addf %77, %78 : vector<1x16xf32>
    %80 = vector.extract_strided_slice %79 {offsets = [0, 0], sizes = [1, 8], strides = [1, 1]} : vector<1x16xf32> to vector<1x8xf32>
    %81 = vector.extract_strided_slice %79 {offsets = [0, 8], sizes = [1, 8], strides = [1, 1]} : vector<1x16xf32> to vector<1x8xf32>
    %82 = arith.addf %80, %81 : vector<1x8xf32>
    %cst_24 = arith.constant 5.120000e+02 : f32
    %83 = vector.broadcast %cst_24 : f32 to vector<1x8xf32>
    %84 = arith.divf %82, %83 : vector<1x8xf32>
    %85 = arith.mulf %67, %67 : vector<1x8xf32>
    %86 = arith.subf %84, %85 : vector<1x8xf32>
    %cst_25 = arith.constant 0.000000e+00 : f32
    %87 = vector.broadcast %cst_25 : f32 to vector<1x8xf32>
    %88 = arith.maximumf %86, %87 : vector<1x8xf32>
    %cst_26 = arith.constant 9.99999974E-6 : f32
    %89 = vector.broadcast %cst_26 : f32 to vector<1x8xf32>
    %90 = arith.addf %88, %89 : vector<1x8xf32>
    %91 = math.rsqrt %90 : vector<1x8xf32>
    %c0_27 = arith.constant 0 : index
    %c0_28 = arith.constant 0 : index
    %92 = vector.load %arg7[%c0_27, %c0_28] : memref<1x8xf32, #tpu.memory_space<vmem>>, vector<1x8xf32>
    %93 = arith.mulf %91, %92 : vector<1x8xf32>
    %c0_29 = arith.constant 0 : index
    %c0_30 = arith.constant 0 : index
    %94 = vector.load %arg8[%c0_29, %c0_30] : memref<1x8xf32, #tpu.memory_space<vmem>>, vector<1x8xf32>
    %95 = arith.mulf %67, %93 : vector<1x8xf32>
    %96 = arith.subf %94, %95 : vector<1x8xf32>
    %97 = tpu.concatenate %93, %93, %93, %93, %93, %93, %93, %93, %93, %93, %93, %93, %93, %93, %93, %93 in 1 : vector<1x8xf32>, vector<1x8xf32>, vector<1x8xf32>, vector<1x8xf32>, vector<1x8xf32>, vector<1x8xf32>, vector<1x8xf32>, vector<1x8xf32>, vector<1x8xf32>, vector<1x8xf32>, vector<1x8xf32>, vector<1x8xf32>, vector<1x8xf32>, vector<1x8xf32>, vector<1x8xf32>, vector<1x8xf32> -> vector<1x128xf32>
    %98 = vector.broadcast %97 : vector<1x128xf32> to vector<32x128xf32>
    %99 = arith.mulf %51, %98 : vector<32x128xf32>
    %100 = tpu.concatenate %96, %96, %96, %96, %96, %96, %96, %96, %96, %96, %96, %96, %96, %96, %96, %96 in 1 : vector<1x8xf32>, vector<1x8xf32>, vector<1x8xf32>, vector<1x8xf32>, vector<1x8xf32>, vector<1x8xf32>, vector<1x8xf32>, vector<1x8xf32>, vector<1x8xf32>, vector<1x8xf32>, vector<1x8xf32>, vector<1x8xf32>, vector<1x8xf32>, vector<1x8xf32>, vector<1x8xf32>, vector<1x8xf32> -> vector<1x128xf32>
    %101 = vector.broadcast %100 : vector<1x128xf32> to vector<32x128xf32>
    %102 = arith.addf %99, %101 : vector<32x128xf32>
    %cst_31 = arith.constant 0.000000e+00 : f32
    %103 = vector.broadcast %cst_31 : f32 to vector<32x128xf32>
    %104 = arith.maximumf %102, %103 : vector<32x128xf32>
    %c0_32 = arith.constant 0 : index
    %c0_33 = arith.constant 0 : index
    %105 = vector.load %arg9[%c0_32, %c0_33] : memref<128x192xf32, #tpu.memory_space<vmem>>, vector<128x192xf32>
    %cst_34 = arith.constant dense<0.000000e+00> : vector<32x192xf32>
    %106 = tpu.matmul %104, %105, %cst_34 {dimension_numbers = #tpu.dot_dimension_numbers<[1], [0], [0], [1], [0, 0, 1, 1], [], []>} : vector<32x128xf32>, vector<128x192xf32>, vector<32x192xf32> -> vector<32x192xf32>
    %c0_35 = arith.constant 0 : index
    %c0_36 = arith.constant 0 : index
    %107 = vector.load %arg10[%c0_35, %c0_36] : memref<1x192xf32, #tpu.memory_space<vmem>>, vector<1x192xf32>
    %108 = vector.broadcast %107 : vector<1x192xf32> to vector<32x192xf32>
    %109 = arith.addf %106, %108 : vector<32x192xf32>
    %110 = math.tanh %109 : vector<32x192xf32>
    %c0_37 = arith.constant 0 : index
    %c0_38 = arith.constant 0 : index
    %111 = vector.load %arg11[%c0_37, %c0_38] : memref<32x192xf32, #tpu.memory_space<vmem>>, vector<32x192xf32>
    tpu.vector_store %arg11[%c0_37, %c0_38], %110 {strides = array<i32>} : memref<32x192xf32, #tpu.memory_space<vmem>>, vector<32x192xf32>,
    return
  }
}

</mosaic_0001>

<bundles_post_ra>
// kernel: cnn_generator_exp_forward.2
= control target key start
LH: loop header
LB: loop body
LE: loop exit
PB: predicated region body
PF: predicated region fallthrough
CT: control target
= control target key end

     0   :  { %20 = vsyncpa [#allocation3], 0  ;;  %s1339_s0 = inlined_call_operand.hbm [shape: f32[2,4], index: 0, kind: input, shape index: {}]   ;;  %s1340_s1 = inlined_call_operand.hbm [shape: f32[2,16], index: 1, kind: input, shape index: {}]   ;;  %s1341_s2 = inlined_call_operand.hbm [shape: f32[2,5], index: 2, kind: input, shape index: {}]   ;;  %s1342_s3 = inlined_call_operand.hbm [shape: f32[5,8], index: 3, kind: input, shape index: {}]   ;;  %s1343_s4 = inlined_call_operand.hbm [shape: f32[5,8], index: 4, kind: input, shape index: {}]   ;;  %s1344_s5 = inlined_call_operand.hbm [shape: f32[5,8], index: 5, kind: input, shape index: {}]   ;;  %s1345_s6 = inlined_call_operand.hbm [shape: f32[4,8], index: 6, kind: input, shape index: {}]   ;;  %s1346_s7 = inlined_call_operand.hbm [shape: f32[8,512], index: 7, kind: input, shape index: {}]   ;;  %s1347_s8 = inlined_call_operand.hbm [shape: f32[16,512], index: 8, kind: input, shape index: {}]   ;;  %s1348_s9 = inlined_call_operand.hbm [shape: f32[8,512], index: 9, kind: input, shape index: {}]   ;;  %s1349_s10 = inlined_call_operand.hbm [shape: f32[1,512], index: 10, kind: input, shape index: {}]   ;;  %s1350_s11 = inlined_call_operand.hbm [shape: f32[1,512], index: 11, kind: input, shape index: {}]   ;;  %s1351_s12 = inlined_call_operand.hbm [shape: f32[1,512], index: 12, kind: input, shape index: {}]   ;;  %s1352_s13 = inlined_call_operand.vmem [shape: f32[2,512], index: 13, kind: output, shape index: {0}]   ;;  %s1353_s14 = inlined_call_operand.vmem [shape: f32[5,1], index: 14, kind: output, shape index: {1}]  }
   0x1   :  { %21 = vsyncpa [#allocation5], 0 }
   0x2   :  { %22 = vsyncpa [#allocation8], 0 }
   0x3   :  { %23 = vsyncpa [#allocation11], 0 }
   0x4   :  { %24 = vsyncpa [#allocation14], 0 }
   0x5   :  { %25 = vsyncpa [#allocation17], 0  ;;  %s43_s15 = sshll.u32 %s1340_s1, 4  ;;  %s44_s15 = int_to_ptr.hbm [resolvable:$true] %s43_s15 }
   0x6   :  { %26 = vsyncpa [#allocation20], 0  ;;  %s1160_s16 = smov [#allocation4]   ;;  %s65_s20 = sshll.u32 %s1342_s3, 4  ;;  %s66_s20 = int_to_ptr.hbm [resolvable:$true] %s65_s20 }
   0x7   :  { %s45_s17 = sshll.u32 %s1160_s16, 4  ;;  %s1161_s21 = smov [#allocation7]   ;;  %s46_s17 = int_to_ptr.vmem [resolvable:$true] %s45_s17 }
   0x8   :  { %48 = dma.hbm_to_vmem [thread:$0]  %s44_s15, 32, %s46_s17, [#allocation5]  }
   0x9   :  { %s67_s22 = sshll.u32 %s1161_s21, 4  ;;  %s87_s25 = sshll.u32 %s1344_s5, 4  ;;  %s68_s22 = int_to_ptr.vmem [resolvable:$true] %s67_s22  ;;  %s88_s25 = int_to_ptr.hbm [resolvable:$true] %s87_s25 }
   0xa   :  { %70 = dma.hbm_to_vmem [thread:$0]  %s66_s20, 128, %s68_s22, [#allocation8]  }
   0xb   :  { %s109_s27 = sshll.u32 %s1346_s7, 4  ;;  %s1162_s28 = smov [#allocation10]   ;;  %s110_s27 = int_to_ptr.hbm [resolvable:$true] %s109_s27 }
   0xc   :  { %s89_s29 = sshll.u32 %s1162_s28, 4  ;;  %s1163_s3 = smov [#allocation13]   ;;  %s90_s29 = int_to_ptr.vmem [resolvable:$true] %s89_s29 }
   0xd   :  { %92 = dma.hbm_to_vmem [thread:$0]  %s88_s25, 128, %s90_s29, [#allocation11]  }
   0xe   :  { %s111_s30 = sshll.u32 %s1163_s3, 4  ;;  %s133_s17 = sshll.u32 %s1348_s9, 4  ;;  %s112_s30 = int_to_ptr.vmem [resolvable:$true] %s111_s30  ;;  %s134_s17 = int_to_ptr.hbm [resolvable:$true] %s133_s17 }
   0xf   :  { %114 = dma.hbm_to_vmem [thread:$0]  %s110_s27, 512, %s112_s30, [#allocation14]  }
  0x10   :  { %s155_s19 = sshll.u32 %s1350_s11, 4  ;;  %s1164_s20 = smov [#allocation16]   ;;  %s156_s19 = int_to_ptr.hbm [resolvable:$true] %s155_s19 }
  0x11   :  { %s135_s7 = sshll.u32 %s1164_s20, 4  ;;  %s1165_s21 = smov [#allocation19]   ;;  %s136_s7 = int_to_ptr.vmem [resolvable:$true] %s135_s7 }
  0x12   :  { %138 = dma.hbm_to_vmem [thread:$0]  %s134_s17, 512, %s136_s7, [#allocation17]  }
  0x13   :  { %s157_s22 = sshll.u32 %s1165_s21, 4  ;;  %s32_s25 = sshll.u32 %s1339_s0, 4  ;;  %s158_s22 = int_to_ptr.vmem [resolvable:$true] %s157_s22  ;;  %s33_s25 = int_to_ptr.hbm [resolvable:$true] %s32_s25 }
  0x14   :  { %160 = dma.hbm_to_vmem [thread:$0]  %s156_s19, 64, %s158_s22, [#allocation20]  }
  0x15   :  { %s54_s26 = sshll.u32 %s1341_s2, 4  ;;  %s1166_s27 = smov [#allocation2]   ;;  %s55_s26 = int_to_ptr.hbm [resolvable:$true] %s54_s26 }
  0x16   :  { %s34_s11 = sshll.u32 %s1166_s27, 4  ;;  %s1167_s28 = smov [#allocation6]   ;;  %s35_s11 = int_to_ptr.vmem [resolvable:$true] %s34_s11 }
  0x17   :  { %37 = dma.hbm_to_vmem [thread:$0]  %s33_s25, 32, %s35_s11, [#allocation3]  }
  0x18   :  { %s56_s29 = sshll.u32 %s1167_s28, 4  ;;  %s76_s15 = sshll.u32 %s1343_s4, 4  ;;  %s57_s29 = int_to_ptr.vmem [resolvable:$true] %s56_s29  ;;  %s77_s15 = int_to_ptr.hbm [resolvable:$true] %s76_s15 }
  0x19   :  { %59 = dma.hbm_to_vmem [thread:$0]  %s55_s26, 32, %s57_s29, [#allocation5]  }
  0x1a   :  { %s98_s17 = sshll.u32 %s1345_s6, 4  ;;  %s1168_s5 = smov [#allocation9]   ;;  %s99_s17 = int_to_ptr.hbm [resolvable:$true] %s98_s17 }
  0x1b   :  { %s78_s2 = sshll.u32 %s1168_s5, 4  ;;  %s1169_s18 = smov [#allocation12]   ;;  %s79_s2 = int_to_ptr.vmem [resolvable:$true] %s78_s2 }
  0x1c   :  { %81 = dma.hbm_to_vmem [thread:$0]  %s77_s15, 128, %s79_s2, [#allocation8]  }
  0x1d   :  { %s100_s19 = sshll.u32 %s1169_s18, 4  ;;  %s119_s21 = sshll.u32 %s1347_s8, 4  ;;  %s101_s19 = int_to_ptr.vmem [resolvable:$true] %s100_s19  ;;  %s120_s21 = int_to_ptr.hbm [resolvable:$true] %s119_s21 }
  0x1e   :  { %103 = dma.hbm_to_vmem [thread:$0]  %s99_s17, 64, %s101_s19, [#allocation11]  }
  0x1f   :  { %s1170_s4 = smov [#allocation15]   ;;  %s144_s6 = sshll.u32 %s1349_s10, 4  ;;  %s145_s6 = int_to_ptr.hbm [resolvable:$true] %s144_s6 }
  0x20   :  { %s121_s22 = sshll.u32 %s1170_s4, 4  ;;  %s1171_s25 = smov 512   ;;  %s122_s22 = int_to_ptr.vmem [resolvable:$true] %s121_s22 }
  0x21   :  { %s1172_s9 = smov 32   ;;  %s1173_s1 = smov [#allocation18]  }
  0x22   :  { %127 = dma.hbm_to_vmem [thread:$0]  %s120_s21, 1024, %s122_s22, [#allocation14], %s1171_s25, %s1171_s25, %s1172_s9  }
  0x23   :  { %s146_s26 = sshll.u32 %s1173_s1, 4  ;;  %s166_s8 = sshll.u32 %s1351_s12, 4  ;;  %s147_s26 = int_to_ptr.vmem [resolvable:$true] %s146_s26  ;;  %s167_s8 = int_to_ptr.hbm [resolvable:$true] %s166_s8 }
  0x24   :  { %149 = dma.hbm_to_vmem [thread:$0]  %s145_s6, 64, %s147_s26, [#allocation17]  }
  0x25   :  { %s1174_s28 = smov [#allocation21]  }
  0x26   :  { %s168_s29 = sshll.u32 %s1174_s28, 4  ;;  %s169_s29 = int_to_ptr.vmem [resolvable:$true] %s168_s29 }
  0x27   :  { %171 = dma.hbm_to_vmem [thread:$0]  %s167_s8, 64, %s169_s29, [#allocation20]  }
  0x28   :  { %1146 = dma.done.wait [#allocation3], 32  }
  0x29   :  { %1147 = vsyncadd [#allocation3], 4294967264 }
  0x2a   :  { %1148 = dma.done.wait [#allocation5], 64  }
  0x2b   :  { %1149 = vsyncadd [#allocation5], 4294967232 }
  0x2c   :  { %1150 = dma.done.wait [#allocation8], 256  }
  0x2d   :  { %1151 = vsyncadd [#allocation8], 4294967040 }
  0x2e   :  { %1152 = dma.done.wait [#allocation11], 192  }
  0x2f   :  { %1153 = vsyncadd [#allocation11], 4294967104 }
  0x30   :  { %1154 = dma.done.wait [#allocation14], 1536  }
  0x31   :  { %1155 = vsyncadd [#allocation14], 4294965760 }
  0x32   :  { %1156 = dma.done.wait [#allocation17], 576  }
  0x33   :  { %1157 = vsyncadd [#allocation17], 4294966720 }
  0x34   :  { %1158 = dma.done.wait [#allocation20], 128  }
  0x35   :  { %1159 = vsyncadd [#allocation20], 4294967168  ;;  %vm273_vm0 = vcmask 1043456   ;;  %vm269_vm1 = vcmask 31744   ;;  %v268_v0 = vld [vmem:[#allocation12] sm:$0xf] }
  0x36   :  { %v267_v1 = vld [vmem:[#allocation2] sm:$0x3]  ;;  %788 = vmatpush.msk.msra.mxu1 %vm273_vm0, %v268_v0  ;;  %v225_v2 = vld [vmem:[#allocation9] sm:$0x1f]  ;;  %v321_v5 = vld [vmem:[#allocation15 + $0x20] sm:$0xff]  ;;  %vm325_vm2 = vcmask 130048  }
  0x37   :  { %789 = vmatmul.msk.f32.vlgmr.msra.gmra.mxu1 %vm269_vm1, %v267_v1  ;;  %v227_v3 = vand.u32 2147483647, %v225_v2  ;;  %v322_v4 = vld [vmem:[#allocation15 + $0x28] sm:$0xff]  ;;  %343 = vmatpush.msra.mxu2 %v321_v5  ;;  %v316_v7 = vld [vmem:[#allocation4] sm:$0x3]  ;;  %v324_v10 = vld [vmem:[#allocation15 + $0x38] sm:$0xff] }
  0x38   :  { %363 = vmatpush.msra.mxu3 %v322_v4  ;;  %v318_v6 = vld [vmem:[#allocation15 + $0x8] sm:$0xff]  ;;  %v317_v8 = vld [vmem:[#allocation15] sm:$0xff]  ;;  %v320_v12 = vld [vmem:[#allocation15 + $0x18] sm:$0xff]  ;;  %403 = vmatpush.msrb.mxu1 %v324_v10  ;;  %v226_v15 = vmax.f32 %v225_v2, 0.0  ;;  %vm243_vm3 = vcmask 1044480   ;;  %vm239_vm4 = vcmask 39936  }
  0x39   :  { %v228_v9 = vsub.f32 0.0, %v227_v3  ;;  %344 = vmatpush.msra.mxu2 %v317_v8  ;;  %v235_v18 = vld [vmem:[#allocation10] sm:$0x1f]  ;;  %v224_v20 = vld [vmem:[#allocation7] sm:$0x1f]  ;;  %vm409_vm5 = vcmask 64512  }
  0x3a   :  { %364 = vmatpush.msra.mxu3 %v318_v6  ;;  %790 = vmatmul.msk.f32.vlgmr.msra.gmra.mxu2 %vm325_vm2, %v316_v7  ;;  %v238_v23 = vld [vmem:[#allocation6] sm:$0x3]  ;;  %v323_v24 = vld [vmem:[#allocation15 + $0x30] sm:$0xff]  ;;  %v313_v26 = vld [vmem:[#allocation13 + $0x8] sm:$0xff]  ;;  %v301_v37 = vmul.f32 %v224_v20, %v224_v20  ;;  %vm305_vm6 = vcmask 61440   ;;  %v1175_v49 = vmov 2.0  }
  0x3b   :  { %v229_v11 = vmul.f32 1.442695, %v228_v9  ;;  %791 = vmatmul.msk.f32.vlgmr.msra.gmra.mxu3 %vm325_vm2, %v316_v7  ;;  %404 = vmatpush.msrb.mxu1 %v320_v12  ;;  %v319_v25 = vld [vmem:[#allocation15 + $0x10] sm:$0xff]  ;;  %v312_v27 = vld [vmem:[#allocation13] sm:$0xff]  ;;  %v315_v29 = vld [vmem:[#allocation13 + $0x18] sm:$0xff]  ;;  %vm598_vm7 = vcmask 1041408  }
  0x3c   :  { %448 = vmatpush.msrb.mxu3 %v313_v26  ;;  %v314_v28 = vld [vmem:[#allocation13 + $0x10] sm:$0xff]  ;;  %428 = vmatpush.msrb.mxu2 %v312_v27  ;;  %v494_v30 = vld [vmem:[#allocation16 + $0x8] sm:$0xff]  ;;  %v493_v31 = vld [vmem:[#allocation16] sm:$0xff]  ;;  %vm310_vm9 = vcmask 4096  }
  0x3d   :  { %818 = vpow2.f32 %v229_v11  ;;  %v495_v32 = vld [vmem:[#allocation16 + $0x10] sm:$0xff]  ;;  %488 = vmatpush.msra.mxu1 %v315_v29  ;;  %v496_v33 = vld [vmem:[#allocation16 + $0x18] sm:$0xff]  ;;  %v584_v52 = vld [vmem:[#allocation18] sm:$0xf] }
  0x3e   :  { %535 = vmatpush.msra.mxu3 %v494_v30  ;;  %515 = vmatpush.msra.mxu2 %v493_v31  ;;  %v588_v56 = vperm.slane %v584_v52, 2  ;;  %v589_v60 = vperm.slane %v584_v52, 3  ;;  %v586_v6 = vperm.slane %v584_v52, 0 }
  0x3f   :  { %793 = vmatmul.msk.f32.vlgmr.msrb.gmra.mxu1 %vm325_vm2, %v316_v7 }
  0x40   :  { %575 = vmatpush.msrb.mxu1 %v496_v33 }
  0x43   :  { %v819_v13 = vpop.eup %818 }
  0x44   :  { %v231_v14 = vadd.f32 1.0, %v819_v13 }
  0x46   :  { %820 = vlog2.f32 %v231_v14 }
  0x4c   :  { %v821_v16 = vpop.eup %820 }
  0x4d   :  { %v233_v17 = vmul.f32 0.6931472, %v821_v16 }
  0x4f   :  { %v234_v19 = vadd.f32 %v233_v17, %v226_v15 }
  0x51   :  { %v236_v21 = vmul.f32 %v235_v18, %v234_v19  ;;  %822 = vlog2.f32 %v234_v19  ;;  %v303_v40 = vmul.f32 %v234_v19, %v234_v19 }
  0x52   :  { %824 = vrcp.f32 %v1175_v49 }
  0x53   :  { %v237_v22 = vadd.f32 %v236_v21, %v224_v20 }
  0x55   :  { %786 = vmatpush.msk.msra.mxu0 %vm243_vm3, %v237_v22 }
  0x56   :  { %787 = vmatmul.msk.f32.vlgmr.msra.gmra.mxu0 %vm239_vm4, %v238_v23 }
  0x57   :  { %383 = vmatpush.msrb.mxu0 %v323_v24  ;;  %v823_v35 = vpop.eup %822 }
  0x58   :  { %v298_v36 = vmul.f32 0.6931472, %v823_v35  ;;  %v825_v53 = vpop.eup %824 }
  0x59   :  { %384 = vmatpush.msrb.mxu0 %v319_v25  ;;  %v628_v59 = vmul.f32 2.0, %v825_v53  ;;  %vm632_vm8 = vweird.f32 %v825_v53 }
  0x5a   :  { %v299_v38 = vmul.f32 2.0, %v298_v36 }
  0x5b   :  { %468 = vmatpush.msra.mxu0 %v314_v28  ;;  %v629_v2 = vsub.f32 1.0, %v628_v59 }
  0x5c   :  { %v300_v39 = vadd.f32 1.0, %v299_v38 }
  0x5d   :  { %v630_v16 = vmul.f32 %v825_v53, %v629_v2 }
  0x5e   :  { %792 = vmatmul.msk.f32.vlgmr.msrb.gmra.mxu0 %vm325_vm2, %v316_v7  ;;  %v302_v41 = vsub.f32 %v300_v39, %v301_v37  ;;  %v587_v7 = vperm.slane %v584_v52, 1 }
  0x5f   :  { %555 = vmatpush.msrb.mxu0 %v495_v32  ;;  %v631_v25 = vadd.f32 %v825_v53, %v630_v16 }
  0x60   :  { %v304_v42 = vsub.f32 %v302_v41, %v303_v40 }
  0x62   :  { %v306_v43 = vsel %vm305_vm6, %v304_v42, 0.0 }
  0x63   :  { %307 = vadd.xlane.f32.xlu0 %v306_v43 }
  0xb4   :  { %v294_v34 = vpop.f32.mrf.mxu1 }
  0xb5   :  { %795 = vmatmul.msk.f32.vlgmr.msrb.gmra.mxu3 %vm409_vm5, %v294_v34  ;;  %794 = vmatmul.msk.f32.vlgmr.msrb.gmra.mxu2 %vm409_vm5, %v294_v34 }
  0xb6   :  { %796 = vmatmul.msk.f32.vlgmr.msra.gmra.mxu0 %vm409_vm5, %v294_v34  ;;  %797 = vmatmul.msk.f32.vlgmr.msra.gmra.mxu1 %vm409_vm5, %v294_v34  ;;  %v633_v34 = vsel %vm632_vm8, %v825_v53, %v631_v25  ;;  %vm766_vm8 = vcmask 1045508  }
  0xbc   :  { %v406_v46 = vpop.f32.mrf.mxu1 }
  0xbd   :  { %v346_v48 = vpop.f32.mrf.mxu2 }
  0xbe   :  { %v366_v47 = vpop.f32.mrf.mxu3 }
  0xd3   :  { %v264_v44 = vpop.f32.mrf.mxu0 }
  0xd4   :  { %798 = vmatmul.msk.f32.vlgmr.msra.gmra.mxu2 %vm409_vm5, %v264_v44  ;;  %799 = vmatmul.msk.f32.vlgmr.msra.gmra.mxu3 %vm409_vm5, %v264_v44 }
  0xd5   :  { %800 = vmatmul.msk.f32.vlgmr.msrb.gmra.mxu0 %vm409_vm5, %v264_v44  ;;  %801 = vmatmul.msk.f32.vlgmr.msrb.gmra.mxu1 %vm409_vm5, %v264_v44 }
  0xdb   :  { %v386_v45 = vpop.f32.mrf.mxu0 }
 0x133   :  { %v470_v50 = vpop.f32.mrf.mxu0  ;;  %v490_v51 = vpop.f32.mrf.mxu1 }
 0x134   :  { %v471_v57 = vadd.f32 %v470_v50, %v386_v45  ;;  %v491_v58 = vadd.f32 %v490_v51, %v406_v46 }
 0x138   :  { %v450_v54 = vpop.f32.mrf.mxu3  ;;  %v430_v55 = vpop.f32.mrf.mxu2 }
 0x139   :  { %v451_v4 = vadd.f32 %v450_v54, %v366_v47  ;;  %v431_v5 = vadd.f32 %v430_v55, %v346_v48 }
 0x152   :  { %v557_v61 = vpop.f32.mrf.mxu0  ;;  %v577_v62 = vpop.f32.mrf.mxu1 }
 0x153   :  { %v582_v63 = vadd.f32 %v557_v61, %v471_v57  ;;  %v583_v0 = vadd.f32 %v577_v62, %v491_v58 }
 0x155   :  { %v596_v1 = vadd.f32 %v588_v56, %v582_v63  ;;  %v597_v3 = vadd.f32 %v589_v60, %v583_v0 }
 0x157   :  { %v613_v8 = vsel %vm598_vm7, %v596_v1, 0.0  ;;  %v620_v9 = vsel %vm598_vm7, %v597_v3, 0.0  ;;  %v517_v10 = vpop.f32.mrf.mxu2  ;;  %v537_v11 = vpop.f32.mrf.mxu3 }
 0x158   :  { %v614_v12 = vrot.slane %v613_v8, 4  ;;  %v621_v13 = vrot.slane %v620_v9, 4  ;;  %v580_v14 = vadd.f32 %v517_v10, %v431_v5  ;;  %v581_v15 = vadd.f32 %v537_v11, %v451_v4 }
 0x15a   :  { %v615_v17 = vadd.f32 %v614_v12, %v613_v8  ;;  %v622_v18 = vadd.f32 %v621_v13, %v620_v9  ;;  %v594_v19 = vadd.f32 %v586_v6, %v580_v14  ;;  %v595_v20 = vadd.f32 %v587_v7, %v581_v15 }
 0x15c   :  { %v616_v21 = vrot.slane %v615_v17, 2  ;;  %v623_v22 = vrot.slane %v622_v18, 2  ;;  %v599_v23 = vsel %vm598_vm7, %v594_v19, 0.0  ;;  %v606_v24 = vsel %vm598_vm7, %v595_v20, 0.0 }
 0x15d   :  { %v600_v26 = vrot.slane %v599_v23, 4  ;;  %v607_v27 = vrot.slane %v606_v24, 4 }
 0x15e   :  { %v617_v28 = vadd.f32 %v616_v21, %v615_v17  ;;  %v624_v29 = vadd.f32 %v623_v22, %v622_v18 }
 0x15f   :  { %v601_v30 = vadd.f32 %v600_v26, %v599_v23  ;;  %v608_v31 = vadd.f32 %v607_v27, %v606_v24  ;;  %v308_v27 = vpop.xlane.xlu0 %307 }
 0x160   :  { %v618_v32 = vrot.slane %v617_v28, 1  ;;  %v625_v33 = vrot.slane %v624_v29, 1 }
 0x161   :  { %v602_v35 = vrot.slane %v601_v30, 2  ;;  %v609_v36 = vrot.slane %v608_v31, 2 }
 0x162   :  { %v619_v37 = vadd.f32 %v618_v32, %v617_v28  ;;  %v626_v38 = vadd.f32 %v625_v33, %v624_v29  ;;  %v309_v29 = vsub.f32 0.0, %v308_v27 }
 0x163   :  { %v603_v39 = vadd.f32 %v602_v35, %v601_v30  ;;  %v610_v40 = vadd.f32 %v609_v36, %v608_v31 }
 0x164   :  { %v636_v41 = vmul.f32 %v633_v34, %v619_v37  ;;  %v637_v42 = vmul.f32 %v633_v34, %v626_v38  ;;  %311 = vst.msk [vmem:[%s1353_s14] sm:$0x1f] %vm310_vm9, %v309_v29 }
 0x165   :  { %v604_v43 = vrot.slane %v603_v39, 1  ;;  %v611_v44 = vrot.slane %v610_v40, 1 }
 0x166   :  { %v1307_v45 = vsub.f32 %v596_v1, %v636_v41  ;;  %v1309_v46 = vsub.f32 %v597_v3, %v637_v42 }
 0x167   :  { %v605_v47 = vadd.f32 %v604_v43, %v603_v39  ;;  %v612_v48 = vadd.f32 %v611_v44, %v610_v40  ;;  %v726_v43 = vld [vmem:[#allocation19] sm:$0xf] }
 0x168   :  { %v644_v49 = vmul.f32 %v1307_v45, %v1307_v45  ;;  %v645_v50 = vmul.f32 %v1309_v46, %v1309_v46 }
 0x169   :  { %v634_v51 = vmul.f32 %v633_v34, %v605_v47  ;;  %v635_v52 = vmul.f32 %v633_v34, %v612_v48  ;;  %v740_v47 = vld [vmem:[#allocation21] sm:$0xf] }
 0x16a   :  { %v660_v53 = vsel %vm598_vm7, %v644_v49, 0.0  ;;  %v667_v54 = vsel %vm598_vm7, %v645_v50, 0.0 }
 0x16b   :  { %v661_v55 = vrot.slane %v660_v53, 4  ;;  %v668_v56 = vrot.slane %v667_v54, 4  ;;  %v1317_v57 = vsub.f32 %v594_v19, %v634_v51  ;;  %v1319_v58 = vsub.f32 %v595_v20, %v635_v52 }
 0x16c   :  { %v730_v52 = vperm.slane %v726_v43, 2 }
 0x16d   :  { %v662_v59 = vadd.f32 %v661_v55, %v660_v53  ;;  %v669_v60 = vadd.f32 %v668_v56, %v667_v54  ;;  %v642_v61 = vmul.f32 %v1317_v57, %v1317_v57  ;;  %v643_v62 = vmul.f32 %v1319_v58, %v1319_v58 }
 0x16e   :  { %v744_v56 = vperm.slane %v740_v47, 2 }
 0x16f   :  { %v663_v63 = vrot.slane %v662_v59, 2  ;;  %v670_v0 = vrot.slane %v669_v60, 2  ;;  %v646_v1 = vsel %vm598_vm7, %v642_v61, 0.0  ;;  %v653_v3 = vsel %vm598_vm7, %v643_v62, 0.0 }
 0x170   :  { %v647_v2 = vrot.slane %v646_v1, 4  ;;  %v654_v6 = vrot.slane %v653_v3, 4 }
 0x171   :  { %v664_v4 = vadd.f32 %v663_v63, %v662_v59  ;;  %v671_v5 = vadd.f32 %v670_v0, %v669_v60  ;;  %v731_v59 = vperm.slane %v726_v43, 3 }
 0x172   :  { %v648_v7 = vadd.f32 %v647_v2, %v646_v1  ;;  %v655_v10 = vadd.f32 %v654_v6, %v653_v3  ;;  %v745_v1 = vperm.slane %v740_v47, 3  ;;  %v728_v6 = vperm.slane %v726_v43, 0 }
 0x173   :  { %v665_v8 = vrot.slane %v664_v4, 1  ;;  %v672_v9 = vrot.slane %v671_v5, 1 }
 0x174   :  { %v649_v11 = vrot.slane %v648_v7, 2  ;;  %v656_v14 = vrot.slane %v655_v10, 2 }
 0x175   :  { %v666_v12 = vadd.f32 %v665_v8, %v664_v4  ;;  %v673_v13 = vadd.f32 %v672_v9, %v671_v5 }
 0x176   :  { %v650_v15 = vadd.f32 %v649_v11, %v648_v7  ;;  %v657_v18 = vadd.f32 %v656_v14, %v655_v10  ;;  %v743_v14 = vperm.slane %v740_v47, 1 }
 0x177   :  { %v676_v16 = vmul.f32 %v666_v12, %v633_v34  ;;  %v677_v17 = vmul.f32 %v673_v13, %v633_v34 }
 0x178   :  { %v651_v19 = vrot.slane %v650_v15, 1  ;;  %v658_v22 = vrot.slane %v657_v18, 1 }
 0x179   :  { %v680_v20 = vadd.f32 1e-05, %v676_v16  ;;  %v681_v21 = vadd.f32 1e-05, %v677_v17 }
 0x17a   :  { %v652_v23 = vadd.f32 %v651_v19, %v650_v15  ;;  %v659_v24 = vadd.f32 %v658_v22, %v657_v18 }
 0x17b   :  { %826 = vrsqrt.f32 %v680_v20  ;;  %vm708_vm12 = vweird.f32 %v680_v20  ;;  %vm718_vm14 = vweird.f32 %v681_v21 }
 0x17c   :  { %828 = vrsqrt.f32 %v681_v21  ;;  %v674_v25 = vmul.f32 %v652_v23, %v633_v34  ;;  %v675_v26 = vmul.f32 %v659_v24, %v633_v34 }
 0x17e   :  { %v678_v28 = vadd.f32 1e-05, %v674_v25  ;;  %v679_v30 = vadd.f32 1e-05, %v675_v26 }
 0x180   :  { %830 = vrsqrt.f32 %v678_v28  ;;  %vm688_vm3 = vweird.f32 %v678_v28  ;;  %vm698_vm5 = vweird.f32 %v679_v30 }
 0x181   :  { %v827_v31 = vpop.eup %826  ;;  %832 = vrsqrt.f32 %v679_v30 }
 0x182   :  { %v829_v32 = vpop.eup %828  ;;  %v703_v33 = vmul.f32 %v827_v31, %v680_v20  ;;  %vm709_vm10 = vweird.f32 %v827_v31 }
 0x183   :  { %v713_v35 = vmul.f32 %v829_v32, %v681_v21  ;;  %vm719_vm11 = vweird.f32 %v829_v32  ;;  %vm710_vm13 = vmor %vm708_vm12, %vm709_vm10 }
 0x184   :  { %v704_v36 = vmul.f32 %v827_v31, %v703_v33  ;;  %vm720_vm15 = vmor %vm718_vm14, %vm719_vm11 }
 0x185   :  { %v714_v37 = vmul.f32 %v829_v32, %v713_v35 }
 0x186   :  { %v831_v38 = vpop.eup %830  ;;  %v705_v39 = vmul.f32 0.5, %v704_v36 }
 0x187   :  { %v833_v34 = vpop.eup %832  ;;  %v715_v40 = vmul.f32 0.5, %v714_v37  ;;  %v683_v41 = vmul.f32 %v831_v38, %v678_v28  ;;  %vm689_vm1 = vweird.f32 %v831_v38 }
 0x188   :  { %v706_v42 = vsub.f32 1.5, %v705_v39  ;;  %v693_v44 = vmul.f32 %v833_v34, %v679_v30  ;;  %vm699_vm2 = vweird.f32 %v833_v34  ;;  %vm690_vm4 = vmor %vm688_vm3, %vm689_vm1 }
 0x189   :  { %v716_v48 = vsub.f32 1.5, %v715_v40  ;;  %v684_v49 = vmul.f32 %v831_v38, %v683_v41  ;;  %vm700_vm6 = vmor %vm698_vm5, %vm699_vm2 }
 0x18a   :  { %v707_v50 = vmul.f32 %v827_v31, %v706_v42  ;;  %v694_v51 = vmul.f32 %v833_v34, %v693_v44 }
 0x18b   :  { %v717_v53 = vmul.f32 %v829_v32, %v716_v48  ;;  %v685_v54 = vmul.f32 0.5, %v684_v49 }
 0x18c   :  { %v711_v55 = vsel %vm710_vm13, %v827_v31, %v707_v50  ;;  %v695_v60 = vmul.f32 0.5, %v694_v51 }
 0x18d   :  { %v724_v61 = vmul.f32 %v711_v55, %v1307_v45  ;;  %v721_v62 = vsel %vm720_vm15, %v829_v32, %v717_v53  ;;  %v686_v63 = vsub.f32 1.5, %v685_v54  ;;  %v729_v45 = vperm.slane %v726_v43, 1 }
 0x18e   :  { %v725_v0 = vmul.f32 %v721_v62, %v1309_v46  ;;  %v696_v2 = vsub.f32 1.5, %v695_v60  ;;  %v742_v46 = vperm.slane %v740_v47, 0 }
 0x18f   :  { %v738_v3 = vmul.f32 %v730_v52, %v724_v61  ;;  %v687_v4 = vmul.f32 %v831_v38, %v686_v63 }
 0x190   :  { %v739_v5 = vmul.f32 %v731_v59, %v725_v0  ;;  %v697_v7 = vmul.f32 %v833_v34, %v696_v2 }
 0x191   :  { %v752_v8 = vadd.f32 %v744_v56, %v738_v3  ;;  %v691_v9 = vsel %vm690_vm4, %v831_v38, %v687_v4 }
 0x192   :  { %v753_v10 = vadd.f32 %v745_v1, %v739_v5  ;;  %v722_v11 = vmul.f32 %v691_v9, %v1317_v57  ;;  %v701_v12 = vsel %vm700_vm6, %v833_v34, %v697_v7 }
 0x193   :  { %v723_v13 = vmul.f32 %v701_v12, %v1319_v58  ;;  %v756_v16 = vmax.f32 %v752_v8, 0.0 }
 0x194   :  { %v736_v15 = vmul.f32 %v728_v6, %v722_v11  ;;  %v757_v17 = vmax.f32 %v753_v10, 0.0 }
 0x195   :  { %v737_v18 = vmul.f32 %v729_v45, %v723_v13  ;;  %v763_v21 = vrot.slane %v756_v16, 4 }
 0x196   :  { %v750_v19 = vadd.f32 %v742_v46, %v736_v15  ;;  %v764_v22 = vrot.slane %v757_v17, 2 }
 0x197   :  { %v751_v20 = vadd.f32 %v743_v14, %v737_v18 }
 0x198   :  { %v754_v24 = vmax.f32 %v750_v19, 0.0  ;;  %v767_v26 = vsel %vm766_vm8, %v763_v21, %v764_v22 }
 0x199   :  { %v755_v23 = vmax.f32 %v751_v20, 0.0 }
 0x19b   :  { %v762_v25 = vrot.slane %v755_v23, 6 }
 0x19d   :  { %v765_v57 = vsel %vm598_vm7, %v754_v24, %v762_v25 }
 0x19e   :  { %v768_v27 = vsel %vm273_vm0, %v765_v57, %v767_v26 }
 0x19f   :  { %770 = vst [vmem:[%s1352_s13] sm:$0xff] %v768_v27 }
 0x1a0   :  { %779 = vsyncpa [#allocation3], 1 }
 0x1a1   :  { %780 = vsyncpa [#allocation5], 1 }
 0x1a2   :  { %781 = vsyncpa [#allocation8], 1 }
 0x1a3   :  { %782 = vsyncpa [#allocation11], 1 }
 0x1a4   :  { %783 = vsyncpa [#allocation14], 1 }
 0x1a5   :  { %784 = vsyncpa [#allocation17], 1 }
 0x1a6   :  { %785 = vsyncpa [#allocation20], 1 }

// kernel: cnn_generator_exp_forward.3
= control target key start
LH: loop header
LB: loop body
LE: loop exit
PB: predicated region body
PF: predicated region fallthrough
CT: control target
= control target key end

     0   :  { %16 = vsyncpa [#allocation3], 0  ;;  %s1504_s0 = inlined_call_operand.vmem [shape: f32[32,32], index: 0, kind: input, shape index: {}]   ;;  %s1505_s1 = inlined_call_operand.hbm [shape: f32[32,64], index: 1, kind: input, shape index: {}]   ;;  %s1506_s2 = inlined_call_operand.hbm [shape: f32[1,64], index: 2, kind: input, shape index: {}]   ;;  %s1507_s3 = inlined_call_operand.hbm [shape: f32[1,16], index: 3, kind: input, shape index: {}]   ;;  %s1508_s4 = inlined_call_operand.hbm [shape: f32[1,16], index: 4, kind: input, shape index: {}]   ;;  %s1509_s5 = inlined_call_operand.hbm [shape: f32[64,128], index: 5, kind: input, shape index: {}]   ;;  %s1510_s6 = inlined_call_operand.hbm [shape: f32[1,128], index: 6, kind: input, shape index: {}]   ;;  %s1511_s7 = inlined_call_operand.hbm [shape: f32[1,8], index: 7, kind: input, shape index: {}]   ;;  %s1512_s8 = inlined_call_operand.hbm [shape: f32[1,8], index: 8, kind: input, shape index: {}]   ;;  %s1513_s9 = inlined_call_operand.vmem [shape: f32[128,192], index: 9, kind: input, shape index: {}]   ;;  %s1514_s10 = inlined_call_operand.hbm [shape: f32[1,192], index: 10, kind: input, shape index: {}]   ;;  %s1515_s11 = inlined_call_operand.vmem [shape: f32[32,192], index: 11, kind: output, shape index: {}]  }
   0x1   :  { %17 = vsyncpa [#allocation5], 0 }
   0x2   :  { %18 = vsyncpa [#allocation8], 0 }
   0x3   :  { %19 = vsyncpa [#allocation11], 0  ;;  %s41_s19 = sshll.u32 %s1506_s2, 4  ;;  %s42_s19 = int_to_ptr.hbm [resolvable:$true] %s41_s19 }
   0x4   :  { %20 = vsyncpa [#allocation14], 0  ;;  %s1055_s20 = smov [#allocation4]   ;;  %s63_s24 = sshll.u32 %s1508_s4, 4  ;;  %s64_s24 = int_to_ptr.hbm [resolvable:$true] %s63_s24 }
   0x5   :  { %s43_s21 = sshll.u32 %s1055_s20, 4  ;;  %s1056_s25 = smov [#allocation7]   ;;  %s44_s21 = int_to_ptr.vmem [resolvable:$true] %s43_s21 }
   0x6   :  { %46 = dma.hbm_to_vmem [thread:$0]  %s42_s19, 16, %s44_s21, [#allocation5]  }
   0x7   :  { %s65_s26 = sshll.u32 %s1056_s25, 4  ;;  %s87_s29 = sshll.u32 %s1510_s6, 4  ;;  %s66_s26 = int_to_ptr.vmem [resolvable:$true] %s65_s26  ;;  %s88_s29 = int_to_ptr.hbm [resolvable:$true] %s87_s29 }
   0x8   :  { %68 = dma.hbm_to_vmem [thread:$0]  %s64_s24, 16, %s66_s26, [#allocation8]  }
   0x9   :  { %s109_s12 = sshll.u32 %s1512_s8, 4  ;;  %s1057_s13 = smov [#allocation10]   ;;  %s110_s12 = int_to_ptr.hbm [resolvable:$true] %s109_s12 }
   0xa   :  { %s89_s14 = sshll.u32 %s1057_s13, 4  ;;  %s1058_s4 = smov [#allocation13]   ;;  %s90_s14 = int_to_ptr.vmem [resolvable:$true] %s89_s14 }
   0xb   :  { %92 = dma.hbm_to_vmem [thread:$0]  %s88_s29, 16, %s90_s14, [#allocation11]  }
   0xc   :  { %s111_s15 = sshll.u32 %s1058_s4, 4  ;;  %s27_s18 = sshll.u32 %s1505_s1, 4  ;;  %s112_s15 = int_to_ptr.vmem [resolvable:$true] %s111_s15  ;;  %s28_s18 = int_to_ptr.hbm [resolvable:$true] %s27_s18 }
   0xd   :  { %114 = dma.hbm_to_vmem [thread:$0]  %s110_s12, 16, %s112_s15, [#allocation14]  }
   0xe   :  { %s1059_s6 = smov [#allocation2]   ;;  %s52_s8 = sshll.u32 %s1507_s3, 4  ;;  %s53_s8 = int_to_ptr.hbm [resolvable:$true] %s52_s8 }
   0xf   :  { %s29_s19 = sshll.u32 %s1059_s6, 4  ;;  %s1060_s22 = smov 128   ;;  %s30_s19 = int_to_ptr.vmem [resolvable:$true] %s29_s19 }
  0x10   :  { %s1061_s23 = smov 8   ;;  %s1062_s24 = smov [#allocation6]  }
  0x11   :  { %35 = dma.hbm_to_vmem [thread:$0]  %s28_s18, 512, %s30_s19, [#allocation3], %s1060_s22, %s1060_s22, %s1061_s23  }
  0x12   :  { %s54_s25 = sshll.u32 %s1062_s24, 4  ;;  %s73_s1 = sshll.u32 %s1509_s5, 4  ;;  %s55_s25 = int_to_ptr.vmem [resolvable:$true] %s54_s25  ;;  %s74_s1 = int_to_ptr.hbm [resolvable:$true] %s73_s1 }
  0x13   :  { %57 = dma.hbm_to_vmem [thread:$0]  %s53_s8, 16, %s55_s25, [#allocation5]  }
  0x14   :  { %s98_s2 = sshll.u32 %s1511_s7, 4  ;;  %s1063_s30 = smov [#allocation9]   ;;  %s99_s2 = int_to_ptr.hbm [resolvable:$true] %s98_s2 }
  0x15   :  { %s75_s3 = sshll.u32 %s1063_s30, 4  ;;  %s1064_s12 = smov [#allocation12]   ;;  %s76_s3 = int_to_ptr.vmem [resolvable:$true] %s75_s3 }
  0x16   :  { %81 = dma.hbm_to_vmem [thread:$0]  %s74_s1, 1024, %s76_s3, [#allocation8], %s1060_s22, %s1060_s22, %s1061_s23  }
  0x17   :  { %s100_s13 = sshll.u32 %s1064_s12, 4  ;;  %s122_s15 = sshll.u32 %s1514_s10, 4  ;;  %s101_s13 = int_to_ptr.vmem [resolvable:$true] %s100_s13  ;;  %s123_s15 = int_to_ptr.hbm [resolvable:$true] %s122_s15 }
  0x18   :  { %103 = dma.hbm_to_vmem [thread:$0]  %s99_s2, 16, %s101_s13, [#allocation11]  }
  0x19   :  { %s1065_s5 = smov [#allocation15]  }
  0x1a   :  { %s124_s16 = sshll.u32 %s1065_s5, 4  ;;  %s125_s16 = int_to_ptr.vmem [resolvable:$true] %s124_s16 }
  0x1b   :  { %127 = dma.hbm_to_vmem [thread:$0]  %s123_s15, 32, %s125_s16, [#allocation14]  }
  0x1c   :  { %1045 = dma.done.wait [#allocation3], 512  }
  0x1d   :  { %1046 = vsyncadd [#allocation3], 4294966784 }
  0x1e   :  { %1047 = dma.done.wait [#allocation5], 32  }
  0x1f   :  { %1048 = vsyncadd [#allocation5], 4294967264 }
  0x20   :  { %1049 = dma.done.wait [#allocation8], 1040  }
  0x21   :  { %1050 = vsyncadd [#allocation8], 4294966256 }
  0x22   :  { %1051 = dma.done.wait [#allocation11], 32  }
  0x23   :  { %1052 = vsyncadd [#allocation11], 4294967264 }
  0x24   :  { %1053 = dma.done.wait [#allocation14], 48  }
  0x25   :  { %1054 = vsyncadd [#allocation14], 4294967248  ;;  %v171_v0 = vld [vmem:[#allocation2 + $0x18] sm:$0xff]  ;;  %v170_v1 = vld [vmem:[#allocation2 + $0x10] sm:$0xff]  ;;  %vm176_vm0 = vcmask 261120   ;;  %vm218_vm1 = vcmask 523264  }
  0x26   :  { %201 = vmatpush.msra.mxu0 %v171_v0  ;;  %v169_v2 = vld [vmem:[#allocation2 + $0x8] sm:$0xff]  ;;  %v168_v3 = vld [vmem:[#allocation2] sm:$0xff]  ;;  %v166_v6 = vld [vmem:[%s1504_s0 + $0x10] sm:$0xff]  ;;  %s1067_s8 = smov 112   ;;  %v1068_v51 = vmov 128.0   ;;  %s1069_s22 = smov 48  }
  0x27   :  { %v164_v4 = vld [vmem:[%s1504_s0] sm:$0xff]  ;;  %v165_v5 = vld [vmem:[%s1504_s0 + $0x8] sm:$0xff]  ;;  %v167_v7 = vld [vmem:[%s1504_s0 + $0x18] sm:$0xff]  ;;  %s1066_s0 = smov 96   ;;  %805 = vrcp.f32 %v1068_v51  ;;  %s1070_s24 = smov 16   ;;  %vm307_vm6 = vcmask 130048  }
  0x28   :  { %202 = vmatpush.msra.mxu0 %v170_v1  ;;  %v803_v10 = vld [vmem:[#allocation4] ss:$0 sm:$0xff]  ;;  %s1071_s25 = smov 32   ;;  %vm310_vm7 = vcmask 392192   ;;  %s1072_s26 = smov 64   ;;  %vm529_vm12 = vcmask 64512  }
  0x29   :  { %s1073_s27 = smov 120   ;;  %s1075_s1 = smov 24   ;;  %vm532_vm13 = vcmask 195584   ;;  %vm535_vm14 = vcmask 326656   ;;  %vm538_vm15 = vcmask 457728  }
  0x2a   :  { %203 = vmatpush.msra.mxu0 %v169_v2  ;;  %s1076_s28 = smov 40   ;;  %s1077_s29 = smov 72  }
  0x2b   :  { %s1078_s2 = smov 56   ;;  %s1079_s30 = smov 80  }
  0x2c   :  { %204 = vmatpush.msra.mxu0 %v168_v3  ;;  %s1080_s3 = smov 88   ;;  %s1081_s12 = smov 104  }
  0x2d   :  { %752 = vmatmul.msk.f32.vlgmr.msra.gmra.mxu0 %vm176_vm0, %v164_v4  ;;  %v806_v52 = vpop.eup %805 }
  0x2e   :  { %v243_v53 = vmul.f32 128.0, %v806_v52  ;;  %vm247_vm2 = vweird.f32 %v806_v52 }
  0x30   :  { %v244_v54 = vsub.f32 1.0, %v243_v53 }
  0x32   :  { %v245_v55 = vmul.f32 %v806_v52, %v244_v54 }
  0x34   :  { %v246_v56 = vadd.f32 %v806_v52, %v245_v55 }
  0x35   :  { %753 = vmatmul.msk.f32.gmra.mxu0 %vm176_vm0, %v165_v5 }
  0x36   :  { %v248_v59 = vsel %vm247_vm2, %v806_v52, %v246_v56  ;;  %v804_v56 = vld [vmem:[#allocation10] ss:$0 sm:$0xff]  ;;  %vm541_vm2 = vcmask 588800  }
  0x3d   :  { %754 = vmatmul.msk.f32.gmra.mxu0 %vm176_vm0, %v166_v6 }
  0x45   :  { %755 = vmatmul.msk.f32.gmra.mxu0 %vm176_vm0, %v167_v7 }
  0xaa   :  { %v206_v8 = vpop.f32.mrf.mxu0 }
  0xab   :  { %v1189_v13 = vadd.f32 %v803_v10, %v206_v8 }
  0xad   :  { %v250_v16 = vmul.f32 %v1189_v13, %v1189_v13  ;;  %v219_v19 = vsel %vm218_vm1, %v1189_v13, 0.0 }
  0xaf   :  { %v254_v24 = vsel %vm218_vm1, %v250_v16, 0.0  ;;  %v294_v16 = vld [vmem:[#allocation7] sm:$0x1] }
  0xb2   :  { %v209_v9 = vpop.f32.mrf.mxu0 }
  0xb3   :  { %v1187_v11 = vadd.f32 %v803_v10, %v209_v9 }
  0xb5   :  { %v251_v15 = vmul.f32 %v1187_v11, %v1187_v11  ;;  %v220_v17 = vsel %vm218_vm1, %v1187_v11, 0.0 }
  0xb6   :  { %v221_v22 = vadd.f32 %v220_v17, %v219_v19 }
  0xb7   :  { %v255_v20 = vsel %vm218_vm1, %v251_v15, 0.0 }
  0xb8   :  { %v256_v27 = vadd.f32 %v255_v20, %v254_v24  ;;  %v347_v20 = vld [vmem:[#allocation9 + $0x38] sm:$0xff] }
  0xb9   :  { %372 = vmatpush.msra.mxu1 %v347_v20  ;;  %v343_v24 = vld [vmem:[#allocation9 + $0x18] sm:$0xff] }
  0xba   :  { %v212_v12 = vpop.f32.mrf.mxu0 }
  0xbb   :  { %v1191_v14 = vadd.f32 %v803_v10, %v212_v12 }
  0xbd   :  { %v252_v18 = vmul.f32 %v1191_v14, %v1191_v14  ;;  %v222_v21 = vsel %vm218_vm1, %v1191_v14, 0.0 }
  0xbe   :  { %v223_v28 = vadd.f32 %v222_v21, %v221_v22  ;;  %v346_v21 = vld [vmem:[#allocation9 + $0x30] sm:$0xff]  ;;  %v345_v22 = vld [vmem:[#allocation9 + $0x28] sm:$0xff] }
  0xbf   :  { %v257_v25 = vsel %vm218_vm1, %v252_v18, 0.0  ;;  %373 = vmatpush.msra.mxu1 %v346_v21 }
  0xc0   :  { %v258_v31 = vadd.f32 %v257_v25, %v256_v27  ;;  %v342_v25 = vld [vmem:[#allocation9 + $0x10] sm:$0xff]  ;;  %v341_v27 = vld [vmem:[#allocation9 + $0x8] sm:$0xff] }
  0xc1   :  { %374 = vmatpush.msra.mxu1 %v345_v22 }
  0xc2   :  { %v215_v23 = vpop.f32.mrf.mxu0 }
  0xc3   :  { %v1208_v26 = vadd.f32 %v803_v10, %v215_v23  ;;  %v292_v10 = vld [vmem:[#allocation6] sm:$0x1]  ;;  %v344_v23 = vld [vmem:[#allocation9 + $0x20] sm:$0xff] }
  0xc4   :  { %375 = vmatpush.msra.mxu1 %v344_v23 }
  0xc5   :  { %v224_v29 = vsel %vm218_vm1, %v1208_v26, 0.0  ;;  %v253_v30 = vmul.f32 %v1208_v26, %v1208_v26 }
  0xc6   :  { %v225_v32 = vadd.f32 %v224_v29, %v223_v28  ;;  %376 = vmatpush.msra.mxu1 %v343_v24  ;;  %v340_v28 = vld [vmem:[#allocation9] sm:$0xff] }
  0xc7   :  { %v259_v33 = vsel %vm218_vm1, %v253_v30, 0.0 }
  0xc8   :  { %v260_v34 = vadd.f32 %v259_v33, %v258_v31  ;;  %v226_v35 = vrot.slane %v225_v32, 4  ;;  %377 = vmatpush.msra.mxu1 %v342_v25 }
  0xca   :  { %v227_v36 = vadd.f32 %v226_v35, %v225_v32  ;;  %v261_v37 = vrot.slane %v260_v34, 4  ;;  %378 = vmatpush.msra.mxu1 %v341_v27 }
  0xcc   :  { %v228_v38 = vrot.slane %v227_v36, 2  ;;  %v262_v39 = vadd.f32 %v261_v37, %v260_v34  ;;  %379 = vmatpush.msra.mxu1 %v340_v28 }
  0xce   :  { %v229_v40 = vadd.f32 %v228_v38, %v227_v36  ;;  %v263_v41 = vrot.slane %v262_v39, 2 }
  0xd0   :  { %v230_v42 = vrot.slane %v229_v40, 1  ;;  %v264_v44 = vadd.f32 %v263_v41, %v262_v39 }
  0xd2   :  { %v231_v43 = vadd.f32 %v230_v42, %v229_v40  ;;  %v265_v45 = vrot.slane %v264_v44, 1 }
  0xd4   :  { %233 = vrot.lane.b32.xlu0 %v231_v43, %s1066_s0  ;;  %v266_v46 = vadd.f32 %v265_v45, %v264_v44 }
  0xdc   :  { %268 = vrot.lane.b32.xlu0 %v266_v46, %s1066_s0 }
 0x146   :  { %v234_v47 = vpop.permute.xlu0 %233 }
 0x147   :  { %v236_v48 = vadd.f32 %v234_v47, %v231_v43 }
 0x149   :  { %238 = vrot.lane.b32.xlu1 %v236_v48, %s1067_s8 }
 0x14e   :  { %v269_v49 = vpop.permute.xlu0 %268 }
 0x14f   :  { %v271_v50 = vadd.f32 %v269_v49, %v266_v46 }
 0x151   :  { %273 = vrot.lane.b32.xlu1 %v271_v50, %s1067_s8 }
 0x1bb   :  { %v239_v57 = vpop.permute.xlu1 %238 }
 0x1bc   :  { %v241_v58 = vadd.f32 %v239_v57, %v236_v48 }
 0x1be   :  { %v249_v60 = vmul.f32 %v248_v59, %v241_v58 }
 0x1c0   :  { %v278_v63 = vmul.f32 %v249_v60, %v249_v60 }
 0x1c3   :  { %v274_v61 = vpop.permute.xlu1 %273 }
 0x1c4   :  { %v276_v62 = vadd.f32 %v274_v61, %v271_v50 }
 0x1c6   :  { %v277_v0 = vmul.f32 %v276_v62, %v248_v59 }
 0x1c8   :  { %v279_v1 = vsub.f32 %v277_v0, %v278_v63 }
 0x1ca   :  { %v280_v2 = vmax.f32 %v279_v1, 0.0 }
 0x1cc   :  { %v281_v3 = vadd.f32 1e-05, %v280_v2 }
 0x1ce   :  { %807 = vrsqrt.f32 %v281_v3  ;;  %vm288_vm4 = vweird.f32 %v281_v3 }
 0x1d4   :  { %v808_v4 = vpop.eup %807 }
 0x1d5   :  { %v283_v5 = vmul.f32 %v808_v4, %v281_v3  ;;  %vm289_vm3 = vweird.f32 %v808_v4 }
 0x1d6   :  { %vm290_vm5 = vmor %vm288_vm4, %vm289_vm3  ;;  %vm543_vm3 = vcmask 654336   ;;  %vm545_vm4 = vcmask 719872  }
 0x1d7   :  { %v284_v6 = vmul.f32 %v808_v4, %v283_v5 }
 0x1d9   :  { %v285_v7 = vmul.f32 0.5, %v284_v6 }
 0x1db   :  { %v286_v8 = vsub.f32 1.5, %v285_v7 }
 0x1dd   :  { %v287_v9 = vmul.f32 %v808_v4, %v286_v8 }
 0x1df   :  { %v291_v12 = vsel %vm290_vm5, %v808_v4, %v287_v9  ;;  %vm547_vm5 = vcmask 785408  }
 0x1e0   :  { %v293_v15 = vmul.f32 %v292_v10, %v291_v12 }
 0x1e2   :  { %304 = vrot.lane.b32.xlu0 %v293_v15, %s1069_s22  ;;  %298 = vrot.lane.b32.xlu2 %v293_v15, %s1070_s24  ;;  %v295_v17 = vmul.f32 %v293_v15, %v249_v60 }
 0x1e4   :  { %v296_v18 = vsub.f32 %v294_v16, %v295_v17 }
 0x1e6   :  { %v318_v19 = vperm.slane %v296_v18, 0 }
 0x1e8   :  { %319 = vrot.lane.b32.xlu1 %v318_v19, %s1070_s24 }
 0x1ea   :  { %301 = vrot.lane.b32.xlu2 %v293_v15, %s1071_s25  ;;  %325 = vrot.lane.b32.xlu0 %v318_v19, %s1069_s22 }
 0x1f2   :  { %322 = vrot.lane.b32.xlu2 %v318_v19, %s1071_s25 }
 0x23c   :  { %v299_v29 = vpop.permute.xlu2 %298 }
 0x23d   :  { %v308_v32 = vsel %vm307_vm6, %v293_v15, %v299_v29 }
 0x244   :  { %v302_v30 = vpop.permute.xlu2 %301 }
 0x245   :  { %v309_v33 = vsel %vm176_vm0, %v308_v32, %v302_v30 }
 0x24c   :  { %v323_v37 = vpop.permute.xlu2 %322 }
 0x254   :  { %v305_v31 = vpop.permute.xlu0 %304 }
 0x255   :  { %v311_v34 = vsel %vm310_vm7, %v309_v33, %v305_v31 }
 0x256   :  { %v312_v35 = vperm.slane %v311_v34, 0  ;;  %v1074_v34 = vmov 512.0  }
 0x257   :  { %809 = vrcp.f32 %v1074_v34  ;;  %v648_v34 = vld [vmem:[%s1513_s9 + $0x88] sm:$0xff] }
 0x258   :  { %v313_v43 = vmul.f32 %v312_v35, %v1189_v13  ;;  %v314_v46 = vmul.f32 %v312_v35, %v1187_v11  ;;  %v315_v49 = vmul.f32 %v312_v35, %v1191_v14  ;;  %v316_v52 = vmul.f32 %v312_v35, %v1208_v26 }
 0x25a   :  { %v320_v36 = vpop.permute.xlu1 %319 }
 0x25b   :  { %v328_v38 = vsel %vm307_vm6, %v296_v18, %v320_v36 }
 0x25c   :  { %v326_v39 = vpop.permute.xlu0 %325  ;;  %v329_v40 = vsel %vm176_vm0, %v328_v38, %v323_v37 }
 0x25d   :  { %v330_v41 = vsel %vm310_vm7, %v329_v40, %v326_v39  ;;  %v810_v35 = vpop.eup %809 }
 0x25e   :  { %v331_v42 = vperm.slane %v330_v41, 0  ;;  %v423_v36 = vmul.f32 512.0, %v810_v35  ;;  %vm427_vm8 = vweird.f32 %v810_v35 }
 0x260   :  { %v332_v44 = vadd.f32 %v331_v42, %v313_v43  ;;  %v333_v47 = vadd.f32 %v331_v42, %v314_v46  ;;  %v334_v50 = vadd.f32 %v331_v42, %v315_v49  ;;  %v335_v53 = vadd.f32 %v331_v42, %v316_v52 }
 0x261   :  { %v424_v37 = vsub.f32 1.0, %v423_v36  ;;  %v645_v36 = vld [vmem:[%s1513_s9 + $0x70] sm:$0xff] }
 0x262   :  { %v336_v45 = vmax.f32 %v332_v44, 0.0  ;;  %v337_v48 = vmax.f32 %v333_v47, 0.0  ;;  %v338_v51 = vmax.f32 %v334_v50, 0.0  ;;  %v339_v13 = vmax.f32 %v335_v53, 0.0 }
 0x263   :  { %v425_v38 = vmul.f32 %v810_v35, %v424_v37  ;;  %v646_v37 = vld [vmem:[%s1513_s9 + $0x78] sm:$0xff] }
 0x264   :  { %756 = vmatmul.msk.f32.vlgmr.msra.gmra.mxu1 %vm218_vm1, %v336_v45 }
 0x265   :  { %v426_v39 = vadd.f32 %v810_v35, %v425_v38  ;;  %v643_v38 = vld [vmem:[%s1513_s9 + $0x60] sm:$0xff] }
 0x267   :  { %v428_v44 = vsel %vm427_vm8, %v810_v35, %v426_v39 }
 0x26c   :  { %757 = vmatmul.msk.f32.gmra.mxu1 %vm218_vm1, %v337_v48 }
 0x274   :  { %758 = vmatmul.msk.f32.gmra.mxu1 %vm218_vm1, %v338_v51 }
 0x27c   :  { %759 = vmatmul.msk.f32.gmra.mxu1 %vm218_vm1, %v339_v13 }
 0x2e1   :  { %v381_v54 = vpop.f32.mrf.mxu1 }
 0x2e2   :  { %v1241_v58 = vadd.f32 %v804_v56, %v381_v54 }
 0x2e4   :  { %v430_v26 = vmul.f32 %v1241_v58, %v1241_v58 }
 0x2e9   :  { %v384_v55 = vpop.f32.mrf.mxu1 }
 0x2ea   :  { %v1239_v57 = vadd.f32 %v804_v56, %v384_v55  ;;  %v478_v55 = vld [vmem:[#allocation12] sm:$0x1] }
 0x2ec   :  { %v431_v14 = vmul.f32 %v1239_v57, %v1239_v57  ;;  %v393_v60 = vadd.f32 %v1239_v57, %v1241_v58 }
 0x2ee   :  { %v434_v63 = vadd.f32 %v431_v14, %v430_v26 }
 0x2f1   :  { %v387_v11 = vpop.f32.mrf.mxu1 }
 0x2f2   :  { %v1243_v59 = vadd.f32 %v804_v56, %v387_v11 }
 0x2f4   :  { %v432_v61 = vmul.f32 %v1243_v59, %v1243_v59  ;;  %v394_v0 = vadd.f32 %v393_v60, %v1243_v59  ;;  %v480_v60 = vld [vmem:[#allocation13] sm:$0x1] }
 0x2f6   :  { %v435_v2 = vadd.f32 %v434_v63, %v432_v61 }
 0x2f9   :  { %v390_v62 = vpop.f32.mrf.mxu1 }
 0x2fa   :  { %v1254_v1 = vadd.f32 %v804_v56, %v390_v62 }
 0x2fc   :  { %v395_v3 = vadd.f32 %v394_v0, %v1254_v1  ;;  %v433_v4 = vmul.f32 %v1254_v1, %v1254_v1 }
 0x2fe   :  { %v396_v5 = vrot.slane %v395_v3, 4  ;;  %v436_v6 = vadd.f32 %v435_v2, %v433_v4 }
 0x300   :  { %v397_v7 = vadd.f32 %v396_v5, %v395_v3  ;;  %v437_v8 = vrot.slane %v436_v6, 4 }
 0x302   :  { %v398_v9 = vrot.slane %v397_v7, 2  ;;  %v438_v10 = vadd.f32 %v437_v8, %v436_v6 }
 0x304   :  { %v399_v12 = vadd.f32 %v398_v9, %v397_v7  ;;  %v439_v15 = vrot.slane %v438_v10, 2 }
 0x306   :  { %v400_v16 = vrot.slane %v399_v12, 1  ;;  %v440_v17 = vadd.f32 %v439_v15, %v438_v10  ;;  %v661_v10 = vld [vmem:[%s1513_s9 + $0xf0] sm:$0xff]  ;;  %v659_v15 = vld [vmem:[%s1513_s9 + $0xe0] sm:$0xff] }
 0x307   :  { %669 = vmatpush.msrb.mxu0 %v661_v10  ;;  %760 = vmatpush.msra.mxu2 %v661_v10 }
 0x308   :  { %v401_v18 = vadd.f32 %v400_v16, %v399_v12  ;;  %v441_v19 = vrot.slane %v440_v17, 1  ;;  %v662_v12 = vld [vmem:[%s1513_s9 + $0xf8] sm:$0xff]  ;;  %v660_v16 = vld [vmem:[%s1513_s9 + $0xe8] sm:$0xff] }
 0x309   :  { %698 = vmatpush.msra.mxu3 %v662_v12  ;;  %670 = vmatpush.msrb.mxu0 %v659_v15 }
 0x30a   :  { %403 = vrot.lane.b32.xlu1 %v401_v18, %s1072_s26  ;;  %v442_v20 = vadd.f32 %v441_v19, %v440_v17  ;;  %v657_v17 = vld [vmem:[%s1513_s9 + $0xd0] sm:$0xff]  ;;  %761 = vmatpush.msra.mxu2 %v659_v15 }
 0x30b   :  { %699 = vmatpush.msra.mxu3 %v660_v16  ;;  %671 = vmatpush.msrb.mxu0 %v657_v17 }
 0x30c   :  { %444 = vrot.lane.b32.xlu2 %v442_v20, %s1072_s26  ;;  %762 = vmatpush.msra.mxu2 %v657_v17 }
 0x366   :  { %v445_v21 = vpop.permute.xlu2 %444 }
 0x367   :  { %v447_v22 = vadd.f32 %v445_v21, %v442_v20 }
 0x369   :  { %449 = vrot.lane.b32.xlu1 %v447_v22, %s1066_s0 }
 0x37c   :  { %v404_v23 = vpop.permute.xlu1 %403 }
 0x37d   :  { %v406_v24 = vadd.f32 %v404_v23, %v401_v18  ;;  %v658_v18 = vld [vmem:[%s1513_s9 + $0xd8] sm:$0xff]  ;;  %v656_v23 = vld [vmem:[%s1513_s9 + $0xc8] sm:$0xff] }
 0x37e   :  { %700 = vmatpush.msra.mxu3 %v658_v18 }
 0x37f   :  { %408 = vrot.lane.b32.xlu0 %v406_v24, %s1066_s0 }
 0x380   :  { %701 = vmatpush.msra.mxu3 %v656_v23 }
 0x3db   :  { %v450_v25 = vpop.permute.xlu1 %449 }
 0x3dc   :  { %v452_v27 = vadd.f32 %v450_v25, %v447_v22  ;;  %v655_v22 = vld [vmem:[%s1513_s9 + $0xc0] sm:$0xff]  ;;  %v654_v25 = vld [vmem:[%s1513_s9 + $0xb8] sm:$0xff] }
 0x3dd   :  { %672 = vmatpush.msrb.mxu0 %v655_v22  ;;  %763 = vmatpush.msra.mxu2 %v655_v22 }
 0x3de   :  { %454 = vrot.lane.b32.xlu0 %v452_v27, %s1067_s8  ;;  %702 = vmatpush.msra.mxu3 %v654_v25 }
 0x3f1   :  { %v409_v28 = vpop.permute.xlu0 %408 }
 0x3f2   :  { %v411_v29 = vadd.f32 %v409_v28, %v406_v24  ;;  %v653_v24 = vld [vmem:[%s1513_s9 + $0xb0] sm:$0xff]  ;;  %v652_v28 = vld [vmem:[%s1513_s9 + $0xa8] sm:$0xff] }
 0x3f3   :  { %673 = vmatpush.msrb.mxu0 %v653_v24  ;;  %764 = vmatpush.msra.mxu2 %v653_v24 }
 0x3f4   :  { %413 = vrot.lane.b32.xlu2 %v411_v29, %s1067_s8  ;;  %703 = vmatpush.msra.mxu3 %v652_v28 }
 0x44e   :  { %v414_v30 = vpop.permute.xlu2 %413 }
 0x44f   :  { %v416_v31 = vadd.f32 %v414_v30, %v411_v29  ;;  %v649_v29 = vld [vmem:[%s1513_s9 + $0x90] sm:$0xff]  ;;  %v650_v30 = vld [vmem:[%s1513_s9 + $0x98] sm:$0xff] }
 0x450   :  { %v455_v32 = vpop.permute.xlu0 %454  ;;  %704 = vmatpush.msra.mxu3 %v650_v30 }
 0x451   :  { %v457_v33 = vadd.f32 %v455_v32, %v452_v27  ;;  %418 = vrot.lane.b32.xlu1 %v416_v31, %s1073_s27  ;;  %v651_v27 = vld [vmem:[%s1513_s9 + $0xa0] sm:$0xff] }
 0x452   :  { %674 = vmatpush.msrb.mxu0 %v651_v27  ;;  %765 = vmatpush.msra.mxu2 %v651_v27 }
 0x453   :  { %459 = vrot.lane.b32.xlu2 %v457_v33, %s1073_s27  ;;  %705 = vmatpush.msra.mxu3 %v648_v34 }
 0x454   :  { %675 = vmatpush.msrb.mxu0 %v649_v29  ;;  %766 = vmatpush.msra.mxu2 %v649_v29 }
 0x455   :  { %706 = vmatpush.msra.mxu3 %v646_v37 }
 0x4ad   :  { %v460_v40 = vpop.permute.xlu2 %459 }
 0x4ae   :  { %v462_v42 = vadd.f32 %v460_v40, %v457_v33  ;;  %v647_v33 = vld [vmem:[%s1513_s9 + $0x80] sm:$0xff]  ;;  %v644_v40 = vld [vmem:[%s1513_s9 + $0x68] sm:$0xff] }
 0x4af   :  { %676 = vmatpush.msrb.mxu0 %v647_v33  ;;  %767 = vmatpush.msra.mxu2 %v647_v33 }
 0x4b0   :  { %v463_v46 = vmul.f32 %v462_v42, %v428_v44  ;;  %v642_v42 = vld [vmem:[%s1513_s9 + $0x58] sm:$0xff]  ;;  %707 = vmatpush.msra.mxu3 %v644_v40 }
 0x4b1   :  { %677 = vmatpush.msrb.mxu0 %v645_v36  ;;  %768 = vmatpush.msra.mxu2 %v645_v36 }
 0x4b2   :  { %708 = vmatpush.msra.mxu3 %v642_v42 }
 0x4b3   :  { %678 = vmatpush.msrb.mxu0 %v643_v38  ;;  %769 = vmatpush.msra.mxu2 %v643_v38 }
 0x4c3   :  { %v419_v41 = vpop.permute.xlu1 %418 }
 0x4c4   :  { %v421_v43 = vadd.f32 %v419_v41, %v416_v31  ;;  %v641_v41 = vld [vmem:[%s1513_s9 + $0x50] sm:$0xff] }
 0x4c5   :  { %679 = vmatpush.msrb.mxu0 %v641_v41  ;;  %770 = vmatpush.msra.mxu2 %v641_v41 }
 0x4c6   :  { %v429_v45 = vmul.f32 %v428_v44, %v421_v43 }
 0x4c8   :  { %v464_v47 = vmul.f32 %v429_v45, %v429_v45 }
 0x4ca   :  { %v465_v48 = vsub.f32 %v463_v46, %v464_v47  ;;  %v639_v46 = vld [vmem:[%s1513_s9 + $0x40] sm:$0xff]  ;;  %v640_v47 = vld [vmem:[%s1513_s9 + $0x48] sm:$0xff] }
 0x4cb   :  { %680 = vmatpush.msrb.mxu0 %v639_v46  ;;  %771 = vmatpush.msra.mxu2 %v639_v46 }
 0x4cc   :  { %v466_v49 = vmax.f32 %v465_v48, 0.0  ;;  %709 = vmatpush.msra.mxu3 %v640_v47 }
 0x4ce   :  { %v467_v50 = vadd.f32 1e-05, %v466_v49 }
 0x4d0   :  { %811 = vrsqrt.f32 %v467_v50  ;;  %vm474_vm10 = vweird.f32 %v467_v50 }
 0x4d6   :  { %v812_v51 = vpop.eup %811 }
 0x4d7   :  { %v469_v52 = vmul.f32 %v812_v51, %v467_v50  ;;  %vm475_vm9 = vweird.f32 %v812_v51  ;;  %v637_v50 = vld [vmem:[%s1513_s9 + $0x30] sm:$0xff] }
 0x4d8   :  { %vm476_vm11 = vmor %vm474_vm10, %vm475_vm9  ;;  %681 = vmatpush.msrb.mxu0 %v637_v50  ;;  %772 = vmatpush.msra.mxu2 %v637_v50 }
 0x4d9   :  { %v470_v53 = vmul.f32 %v812_v51, %v469_v52 }
 0x4db   :  { %v471_v13 = vmul.f32 0.5, %v470_v53  ;;  %v635_v53 = vld [vmem:[%s1513_s9 + $0x20] sm:$0xff] }
 0x4dc   :  { %682 = vmatpush.msrb.mxu0 %v635_v53  ;;  %773 = vmatpush.msra.mxu2 %v635_v53 }
 0x4dd   :  { %v472_v54 = vsub.f32 1.5, %v471_v13  ;;  %v636_v13 = vld [vmem:[%s1513_s9 + $0x28] sm:$0xff] }
 0x4df   :  { %v473_v56 = vmul.f32 %v812_v51, %v472_v54  ;;  %v633_v54 = vld [vmem:[%s1513_s9 + $0x10] sm:$0xff] }
 0x4e0   :  { %683 = vmatpush.msrb.mxu0 %v633_v54  ;;  %774 = vmatpush.msra.mxu2 %v633_v54 }
 0x4e1   :  { %v477_v11 = vsel %vm476_vm11, %v812_v51, %v473_v56  ;;  %v638_v51 = vld [vmem:[%s1513_s9 + $0x38] sm:$0xff] }
 0x4e2   :  { %v1267_v14 = vmul.f32 %v478_v55, %v477_v11  ;;  %710 = vmatpush.msra.mxu3 %v638_v51  ;;  %v634_v11 = vld [vmem:[%s1513_s9 + $0x18] sm:$0xff] }
 0x4e4   :  { %490 = vrot.lane.b32.xlu2 %v1267_v14, %s1075_s1  ;;  %487 = vrot.lane.b32.xlu1 %v1267_v14, %s1070_s24  ;;  %v481_v26 = vmul.f32 %v1267_v14, %v429_v45 }
 0x4e5   :  { %484 = vrot.lane.b32.xlu0 %v1267_v14, %s1061_s23  ;;  %711 = vmatpush.msra.mxu3 %v636_v13 }
 0x4e6   :  { %v1293_v61 = vsub.f32 %v480_v60, %v481_v26  ;;  %v632_v60 = vld [vmem:[%s1513_s9 + $0x8] sm:$0xff] }
 0x4e7   :  { %712 = vmatpush.msra.mxu3 %v634_v11 }
 0x4e8   :  { %v561_v62 = vperm.slane %v1293_v61, 0 }
 0x4e9   :  { %713 = vmatpush.msra.mxu3 %v632_v60 }
 0x4ec   :  { %499 = vrot.lane.b32.xlu2 %v1267_v14, %s1069_s22  ;;  %493 = vrot.lane.b32.xlu1 %v1267_v14, %s1071_s25 }
 0x4ed   :  { %496 = vrot.lane.b32.xlu0 %v1267_v14, %s1076_s28 }
 0x4f4   :  { %508 = vrot.lane.b32.xlu2 %v1267_v14, %s1077_s29  ;;  %502 = vrot.lane.b32.xlu1 %v1267_v14, %s1078_s2 }
 0x4f5   :  { %505 = vrot.lane.b32.xlu0 %v1267_v14, %s1072_s26 }
 0x4fc   :  { %517 = vrot.lane.b32.xlu2 %v1267_v14, %s1066_s0  ;;  %511 = vrot.lane.b32.xlu1 %v1267_v14, %s1079_s30 }
 0x4fd   :  { %514 = vrot.lane.b32.xlu0 %v1267_v14, %s1080_s3 }
 0x504   :  { %526 = vrot.lane.b32.xlu2 %v1267_v14, %s1073_s27  ;;  %520 = vrot.lane.b32.xlu1 %v1267_v14, %s1081_s12 }
 0x505   :  { %523 = vrot.lane.b32.xlu0 %v1267_v14, %s1067_s8 }
 0x50c   :  { %568 = vrot.lane.b32.xlu1 %v561_v62, %s1075_s1  ;;  %565 = vrot.lane.b32.xlu2 %v561_v62, %s1070_s24 }
 0x50d   :  { %562 = vrot.lane.b32.xlu0 %v561_v62, %s1061_s23 }
 0x514   :  { %577 = vrot.lane.b32.xlu1 %v561_v62, %s1069_s22  ;;  %574 = vrot.lane.b32.xlu2 %v561_v62, %s1076_s28 }
 0x515   :  { %571 = vrot.lane.b32.xlu0 %v561_v62, %s1071_s25 }
 0x51c   :  { %586 = vrot.lane.b32.xlu1 %v561_v62, %s1077_s29  ;;  %583 = vrot.lane.b32.xlu2 %v561_v62, %s1072_s26 }
 0x51d   :  { %580 = vrot.lane.b32.xlu0 %v561_v62, %s1078_s2 }
 0x524   :  { %595 = vrot.lane.b32.xlu1 %v561_v62, %s1066_s0  ;;  %592 = vrot.lane.b32.xlu2 %v561_v62, %s1080_s3 }
 0x525   :  { %589 = vrot.lane.b32.xlu0 %v561_v62, %s1079_s30 }
 0x52c   :  { %601 = vrot.lane.b32.xlu1 %v561_v62, %s1067_s8  ;;  %604 = vrot.lane.b32.xlu2 %v561_v62, %s1073_s27 }
 0x52d   :  { %598 = vrot.lane.b32.xlu0 %v561_v62, %s1081_s12 }
 0x53e   :  { %v1304_v63 = vpop.permute.xlu2 %490 }
 0x546   :  { %v1306_v0 = vpop.permute.xlu2 %499 }
 0x54e   :  { %v1310_v4 = vpop.permute.xlu2 %508 }
 0x556   :  { %v1308_v2 = vpop.permute.xlu1 %487  ;;  %v1316_v7 = vpop.permute.xlu2 %517 }
 0x557   :  { %v485_v3 = vpop.permute.xlu0 %484 }
 0x558   :  { %v530_v39 = vsel %vm529_vm12, %v1267_v14, %v485_v3  ;;  %v631_v14 = vld [vmem:[%s1513_s9] sm:$0xff] }
 0x559   :  { %v531_v43 = vsel %vm307_vm6, %v530_v39, %v1308_v2  ;;  %684 = vmatpush.msrb.mxu0 %v631_v14  ;;  %775 = vmatpush.msra.mxu2 %v631_v14 }
 0x55a   :  { %v533_v48 = vsel %vm532_vm13, %v531_v43, %v1304_v63 }
 0x55e   :  { %v1312_v5 = vpop.permute.xlu1 %493  ;;  %v1342_v20 = vpop.permute.xlu2 %526 }
 0x55f   :  { %v1314_v6 = vpop.permute.xlu0 %496  ;;  %v534_v49 = vsel %vm176_vm0, %v533_v48, %v1312_v5 }
 0x560   :  { %v536_v55 = vsel %vm535_vm14, %v534_v49, %v1314_v6 }
 0x566   :  { %v1318_v8 = vpop.permute.xlu1 %502  ;;  %v566_v35 = vpop.permute.xlu2 %565 }
 0x567   :  { %v1320_v9 = vpop.permute.xlu0 %505 }
 0x56e   :  { %v1340_v19 = vpop.permute.xlu1 %511  ;;  %v575_v52 = vpop.permute.xlu2 %574 }
 0x56f   :  { %v1344_v21 = vpop.permute.xlu0 %514 }
 0x576   :  { %v1370_v31 = vpop.permute.xlu1 %520 }
 0x577   :  { %v1372_v32 = vpop.permute.xlu0 %523 }
 0x57e   :  { %v569_v44 = vpop.permute.xlu1 %568 }
 0x57f   :  { %v563_v45 = vpop.permute.xlu0 %562 }
 0x580   :  { %v607_v56 = vsel %vm529_vm12, %v1293_v61, %v563_v45  ;;  %v537_v61 = vsel %vm310_vm7, %v536_v55, %v1306_v0  ;;  %v584_v0 = vpop.permute.xlu2 %583 }
 0x581   :  { %v608_v62 = vsel %vm307_vm6, %v607_v56, %v566_v35  ;;  %v539_v2 = vsel %vm538_vm15, %v537_v61, %v1318_v8  ;;  %vm551_vm6 = vcmask 916480  }
 0x582   :  { %v609_v3 = vsel %vm532_vm13, %v608_v62, %v569_v44  ;;  %v540_v5 = vsel %vm218_vm1, %v539_v2, %v1320_v9 }
 0x583   :  { %v542_v10 = vsel %vm541_vm2, %v540_v5, %v1310_v4 }
 0x584   :  { %v544_v8 = vsel %vm543_vm3, %v542_v10, %v1340_v19 }
 0x585   :  { %v546_v9 = vsel %vm545_vm4, %v544_v8, %v1344_v21 }
 0x586   :  { %v578_v26 = vpop.permute.xlu1 %577  ;;  %v548_v4 = vsel %vm547_vm5, %v546_v9, %v1316_v7 }
 0x587   :  { %v572_v63 = vpop.permute.xlu0 %571 }
 0x588   :  { %v610_v6 = vsel %vm176_vm0, %v609_v3, %v572_v63  ;;  %vm549_vm0 = vcmask 850944   ;;  %v593_v24 = vpop.permute.xlu2 %592 }
 0x589   :  { %v611_v12 = vsel %vm535_vm14, %v610_v6, %v575_v52  ;;  %v550_v23 = vsel %vm549_vm0, %v548_v4, %v1370_v31 }
 0x58a   :  { %v612_v17 = vsel %vm310_vm7, %v611_v12, %v578_v26  ;;  %vm553_vm7 = vcmask 982016   ;;  %v552_v21 = vsel %vm551_vm6, %v550_v23, %v1372_v32 }
 0x58b   :  { %v554_v29 = vsel %vm553_vm7, %v552_v21, %v1342_v20 }
 0x58c   :  { %v555_v33 = vperm.slane %v554_v29, 0 }
 0x58e   :  { %v587_v15 = vpop.permute.xlu1 %586  ;;  %v556_v32 = vmul.f32 %v555_v33, %v1241_v58  ;;  %v557_v40 = vmul.f32 %v555_v33, %v1239_v57  ;;  %v558_v44 = vmul.f32 %v555_v33, %v1243_v59  ;;  %v559_v47 = vmul.f32 %v555_v33, %v1254_v1  ;;  %v663_v57 = vld [vmem:[#allocation15] sm:$0x3] }
 0x58f   :  { %v581_v16 = vpop.permute.xlu0 %580  ;;  %v665_v58 = vperm.slane %v663_v57, 0  ;;  %v666_v52 = vperm.slane %v663_v57, 1 }
 0x590   :  { %v613_v18 = vsel %vm538_vm15, %v612_v17, %v581_v16  ;;  %v605_v36 = vpop.permute.xlu2 %604 }
 0x591   :  { %v614_v22 = vsel %vm218_vm1, %v613_v18, %v584_v0 }
 0x592   :  { %v615_v27 = vsel %vm541_vm2, %v614_v22, %v587_v15 }
 0x596   :  { %v596_v19 = vpop.permute.xlu1 %595 }
 0x597   :  { %v590_v25 = vpop.permute.xlu0 %589 }
 0x598   :  { %v616_v28 = vsel %vm543_vm3, %v615_v27, %v590_v25 }
 0x599   :  { %v617_v7 = vsel %vm545_vm4, %v616_v28, %v593_v24 }
 0x59a   :  { %v618_v31 = vsel %vm547_vm5, %v617_v7, %v596_v19 }
 0x59e   :  { %v602_v30 = vpop.permute.xlu1 %601 }
 0x59f   :  { %v599_v34 = vpop.permute.xlu0 %598 }
 0x5a0   :  { %v619_v35 = vsel %vm549_vm0, %v618_v31, %v599_v34 }
 0x5a1   :  { %v620_v37 = vsel %vm551_vm6, %v619_v35, %v602_v30 }
 0x5a2   :  { %v621_v38 = vsel %vm553_vm7, %v620_v37, %v605_v36 }
 0x5a3   :  { %v622_v39 = vperm.slane %v621_v38, 0 }
 0x5a5   :  { %v623_v41 = vadd.f32 %v622_v39, %v556_v32  ;;  %v624_v20 = vadd.f32 %v622_v39, %v557_v40  ;;  %v625_v45 = vadd.f32 %v622_v39, %v558_v44  ;;  %v626_v48 = vadd.f32 %v622_v39, %v559_v47 }
 0x5a7   :  { %v627_v42 = vmax.f32 %v623_v41, 0.0  ;;  %v628_v43 = vmax.f32 %v624_v20, 0.0  ;;  %v629_v46 = vmax.f32 %v625_v45, 0.0  ;;  %v630_v49 = vmax.f32 %v626_v48, 0.0 }
 0x5a9   :  { %685 = vmatmul.f32.vlgmr.msrb.gmra.mxu0 %v627_v42  ;;  %688 = vmatmul.f32.vlgmr.msra.gmra.mxu2 %v628_v43 }
 0x5aa   :  { %714 = vmatmul.f32.vlgmr.msra.gmra.mxu3 %v627_v42 }
 0x5b1   :  { %691 = vmatmul.f32.gmra.mxu2 %v629_v46 }
 0x5b2   :  { %717 = vmatmul.f32.gmra.mxu3 %v628_v43 }
 0x5b9   :  { %694 = vmatmul.f32.gmra.mxu2 %v630_v49 }
 0x5ba   :  { %720 = vmatmul.f32.gmra.mxu3 %v629_v46 }
 0x5c2   :  { %723 = vmatmul.f32.gmra.mxu3 %v630_v49 }
 0x626   :  { %v686_v50 = vpop.f32.mrf.mxu0 }
 0x627   :  { %v687_v51 = vadd.f32 %v686_v50, %v665_v58 }
 0x629   :  { %813 = vtanh.f32 %v687_v51 }
 0x62c   :  { %v689_v53 = vpop.f32.mrf.mxu2 }
 0x62d   :  { %v690_v59 = vadd.f32 %v689_v53, %v665_v58  ;;  %v715_v13 = vpop.f32.mrf.mxu3 }
 0x62e   :  { %v716_v54 = vadd.f32 %v715_v13, %v666_v52 }
 0x62f   :  { %v814_v55 = vpop.eup %813  ;;  %815 = vtanh.f32 %v690_v59 }
 0x630   :  { %735 = vst [vmem:[%s1515_s11] sm:$0xff] %v814_v55  ;;  %817 = vtanh.f32 %v716_v54 }
 0x634   :  { %v692_v1 = vpop.f32.mrf.mxu2 }
 0x635   :  { %v816_v56 = vpop.eup %815  ;;  %v693_v11 = vadd.f32 %v692_v1, %v665_v58  ;;  %v718_v14 = vpop.f32.mrf.mxu3 }
 0x636   :  { %v818_v26 = vpop.eup %817  ;;  %737 = vst [vmem:[%s1515_s11 + $0x10] sm:$0xff] %v816_v56  ;;  %v719_v60 = vadd.f32 %v718_v14, %v666_v52 }
 0x637   :  { %736 = vst.msk [vmem:[%s1515_s11 + $0x8] sm:$0xff] %vm218_vm1, %v818_v26  ;;  %819 = vtanh.f32 %v693_v11 }
 0x638   :  { %821 = vtanh.f32 %v719_v60 }
 0x63c   :  { %v695_v61 = vpop.f32.mrf.mxu2 }
 0x63d   :  { %v820_v62 = vpop.eup %819  ;;  %v696_v63 = vadd.f32 %v695_v61, %v665_v58  ;;  %v721_v2 = vpop.f32.mrf.mxu3 }
 0x63e   :  { %v822_v3 = vpop.eup %821  ;;  %739 = vst [vmem:[%s1515_s11 + $0x20] sm:$0xff] %v820_v62  ;;  %v722_v5 = vadd.f32 %v721_v2, %v666_v52 }
 0x63f   :  { %738 = vst.msk [vmem:[%s1515_s11 + $0x18] sm:$0xff] %vm218_vm1, %v822_v3  ;;  %823 = vtanh.f32 %v696_v63 }
 0x640   :  { %825 = vtanh.f32 %v722_v5 }
 0x645   :  { %v824_v6 = vpop.eup %823  ;;  %v724_v0 = vpop.f32.mrf.mxu3 }
 0x646   :  { %v826_v10 = vpop.eup %825  ;;  %741 = vst [vmem:[%s1515_s11 + $0x30] sm:$0xff] %v824_v6  ;;  %v725_v12 = vadd.f32 %v724_v0, %v666_v52 }
 0x647   :  { %740 = vst.msk [vmem:[%s1515_s11 + $0x28] sm:$0xff] %vm218_vm1, %v826_v10 }
 0x648   :  { %827 = vtanh.f32 %v725_v12 }
 0x64e   :  { %v828_v15 = vpop.eup %827 }
 0x64f   :  { %742 = vst.msk [vmem:[%s1515_s11 + $0x38] sm:$0xff] %vm218_vm1, %v828_v15 }
 0x650   :  { %747 = vsyncpa [#allocation3], 1 }
 0x651   :  { %748 = vsyncpa [#allocation5], 1 }
 0x652   :  { %749 = vsyncpa [#allocation8], 1 }
 0x653   :  { %750 = vsyncpa [#allocation11], 1 }
 0x654   :  { %751 = vsyncpa [#allocation14], 1 }

</bundles_post_ra>
